<compile_context>
chip_gen: v6e
topology: v6e:2x2x1
jax: 0.10.0
libtpu: 0.0.40
codegen_flags: <defaults>
</compile_context>

<pallas_src>
import functools
import math

import jax
import jax.numpy as jnp
from jax import lax
from jax.experimental import pallas as pl
from jax.experimental.pallas import tpu as pltpu


# 48 MiB scoped VMEM: comfortably inside v7x's 64 MiB physical VMEM, and well inside
# the 128 MiB on v5e/v6e, while allowing the full-K/full-N double-buffered tiles.
VMEM_LIMIT = 48 * 1024 * 1024


# --------------------------- tiling helper -----------------------------------

def _pick_tile(dim, want, align):
    """Largest tile <= want that is a multiple of `align` and divides `dim`;
    otherwise the full dim (always satisfies the TPU (8,128) block rule)."""
    if dim <= want:
        return dim
    t = (want // align) * align
    while t >= align:
        if dim % t == 0:
            return t
        t -= align
    return dim


# --------------------------- fused matmul kernels ------------------------------
# Full-K, full-N tiles: grid only over M, so no k-loop, no pl.when init/finalize,
# no f32 accumulator scratch; the weight block index is constant across the grid,
# so Pallas fetches the weight from HBM exactly once per call.

def _linear_kernel(x_ref, w_ref, b_ref, o_ref, *, activation):
    y = jnp.dot(x_ref[...], w_ref[...], preferred_element_type=jnp.float32)
    y = y + b_ref[...]
    if activation == "gelu":
        y = jax.nn.gelu(y, approximate=True)
    o_ref[...] = y.astype(o_ref.dtype)


def _linear_res_ln_kernel(x_ref, w_ref, b_ref, r_ref, g_ref, be_ref, o_ref, *, eps):
    y = jnp.dot(x_ref[...], w_ref[...], preferred_element_type=jnp.float32)
    y = y + b_ref[...] + r_ref[...].astype(jnp.float32)
    mu = jnp.mean(y, axis=-1, keepdims=True)
    var = jnp.mean((y - mu) ** 2, axis=-1, keepdims=True)
    yn = (y - mu) * lax.rsqrt(var + eps)
    o_ref[...] = (yn * g_ref[...] + be_ref[...]).astype(o_ref.dtype)


def linear(x, w, b, activation=None, out_dtype=jnp.bfloat16, tm=512):
    """x:[M,K] (bf16) @ w:[K,N] (bf16) + b:[N] (f32) -> [M,N].  Full K/N per tile."""
    M, K = x.shape
    N = w.shape[1]
    tm = _pick_tile(M, tm, 8)
    grid = (M // tm,)
    out_bytes = M * N * jnp.dtype(out_dtype).itemsize
    cost = pl.CostEstimate(
        flops=2 * M * N * K,
        transcendentals=(M * N if activation == "gelu" else 0),
        bytes_accessed=2 * M * K + 2 * K * N + 4 * N + out_bytes,
    )
    return pl.pallas_call(
        functools.partial(_linear_kernel, activation=activation),
        out_shape=jax.ShapeDtypeStruct((M, N), out_dtype),
        grid=grid,
        in_specs=[
            pl.BlockSpec((tm, K), lambda i: (i, 0)),
            pl.BlockSpec((K, N), lambda i: (0, 0)),
            pl.BlockSpec((1, N), lambda i: (0, 0)),
        ],
        out_specs=pl.BlockSpec((tm, N), lambda i: (i, 0)),
        compiler_params=pltpu.CompilerParams(
            dimension_semantics=("parallel",),
            vmem_limit_bytes=VMEM_LIMIT),
        cost_estimate=cost,
    )(x, w, b.reshape(1, N))


def linear_add_ln(x, w, b, residual, gamma, beta, eps=1e-12,
                  out_dtype=jnp.bfloat16, tm=512):
    """(x @ w + b + residual) -> LayerNorm, fused in one kernel (full K/N per tile)."""
    M, K = x.shape
    N = w.shape[1]
    assert residual.shape == (M, N)
    tm = _pick_tile(M, tm, 8)
    grid = (M // tm,)
    out_bytes = M * N * jnp.dtype(out_dtype).itemsize
    cost = pl.CostEstimate(
        flops=2 * M * N * K + 8 * M * N,
        transcendentals=M,
        bytes_accessed=2 * M * K + 2 * K * N + 4 * N + 2 * M * N + 8 * N + out_bytes,
    )
    return pl.pallas_call(
        functools.partial(_linear_res_ln_kernel, eps=eps),
        out_shape=jax.ShapeDtypeStruct((M, N), out_dtype),
        grid=grid,
        in_specs=[
            pl.BlockSpec((tm, K), lambda i: (i, 0)),
            pl.BlockSpec((K, N), lambda i: (0, 0)),
            pl.BlockSpec((1, N), lambda i: (0, 0)),
            pl.BlockSpec((tm, N), lambda i: (i, 0)),
            pl.BlockSpec((1, N), lambda i: (0, 0)),
            pl.BlockSpec((1, N), lambda i: (0, 0)),
        ],
        out_specs=pl.BlockSpec((tm, N), lambda i: (i, 0)),
        compiler_params=pltpu.CompilerParams(
            dimension_semantics=("parallel",),
            vmem_limit_bytes=VMEM_LIMIT),
        cost_estimate=cost,
    )(x, w, b.reshape(1, N), residual, gamma.reshape(1, N), beta.reshape(1, N))


# --------------------------- layernorm (embeddings) ----------------------------

def _ln_kernel(x_ref, g_ref, b_ref, o_ref, *, eps):
    z = x_ref[...].astype(jnp.float32)
    mu = jnp.mean(z, axis=-1, keepdims=True)
    var = jnp.mean((z - mu) ** 2, axis=-1, keepdims=True)
    zn = (z - mu) * lax.rsqrt(var + eps)
    o_ref[...] = (zn * g_ref[...] + b_ref[...]).astype(o_ref.dtype)


def layernorm(x, gamma, beta, eps=1e-12, out_dtype=jnp.bfloat16, tm=512):
    M, H = x.shape
    tm = _pick_tile(M, tm, 8)
    return pl.pallas_call(
        functools.partial(_ln_kernel, eps=eps),
        out_shape=jax.ShapeDtypeStruct((M, H), out_dtype),
        grid=(M // tm,),
        in_specs=[
            pl.BlockSpec((tm, H), lambda i: (i, 0)),
            pl.BlockSpec((1, H), lambda i: (0, 0)),
            pl.BlockSpec((1, H), lambda i: (0, 0)),
        ],
        out_specs=pl.BlockSpec((tm, H), lambda i: (i, 0)),
        compiler_params=pltpu.CompilerParams(dimension_semantics=("parallel",)),
    )(x, gamma.reshape(1, H), beta.reshape(1, H))


# --------------------------- attention ------------------------------------------
# Reads q/k/v straight out of the fused [B, S, 3, nH, dh] QKV buffer (no HBM head
# split/merge transposes), uses the full sequence as the single KV block (plain
# softmax per q tile -- no online-softmax machinery), and writes the context in
# [B, S, nH, dh] layout so the following reshape to [B*S, H] is free.

def _attn_kernel(q_ref, k_ref, v_ref, m_ref, o_ref, *, scale, nH):
    bias = m_ref[0]                                   # (1, S) f32 additive mask
    for h in range(nH):                               # static unroll over heads
        qh = q_ref[0, :, 0, h, :] * scale             # (tq, dh) bf16, scale folded into q
        kh = k_ref[0, :, 0, h, :]                     # (S,  dh) bf16
        vh = v_ref[0, :, 0, h, :]                     # (S,  dh) bf16
        # q @ k^T via contraction dims -- no K-tile transpose materialization.
        s = lax.dot_general(qh, kh, (((1,), (1,)), ((), ())),
                            preferred_element_type=jnp.float32)      # (tq, S)
        s = s + bias
        s = s - jnp.max(s, axis=-1, keepdims=True)
        p = jnp.exp(s)
        inv = pl.reciprocal(jnp.sum(p, axis=-1, keepdims=True), approx=True)
        p = (p * inv).astype(vh.dtype)
        o_ref[0, :, h, :] = jnp.dot(
            p, vh, preferred_element_type=jnp.float32).astype(o_ref.dtype)


def mha_attention(qkv5, mask_bias, scale, tq=256):
    """qkv5: [B, S, 3, nH, dh] bf16, mask_bias: [B, 1, S] f32 -> [B, S, nH, dh] bf16."""
    B, S, _, nH, dh = qkv5.shape
    tq = _pick_tile(S, tq, 8)
    grid = (B, S // tq)
    cost = pl.CostEstimate(
        flops=4 * B * nH * S * S * dh,
        transcendentals=B * nH * S * S,
        bytes_accessed=2 * B * S * 3 * nH * dh + 2 * B * S * nH * dh + 4 * B * S,
    )
    return pl.pallas_call(
        functools.partial(_attn_kernel, scale=scale, nH=nH),
        out_shape=jax.ShapeDtypeStruct((B, S, nH, dh), jnp.bfloat16),
        grid=grid,
        in_specs=[
            pl.BlockSpec((1, tq, 1, nH, dh), lambda b, qi: (b, qi, 0, 0, 0)),  # q slice
            pl.BlockSpec((1, S, 1, nH, dh), lambda b, qi: (b, 0, 1, 0, 0)),    # k slice
            pl.BlockSpec((1, S, 1, nH, dh), lambda b, qi: (b, 0, 2, 0, 0)),    # v slice
            pl.BlockSpec((1, 1, S), lambda b, qi: (b, 0, 0)),                  # mask bias
        ],
        out_specs=pl.BlockSpec((1, tq, nH, dh), lambda b, qi: (b, qi, 0, 0)),
        compiler_params=pltpu.CompilerParams(
            dimension_semantics=("parallel", "parallel"),
            vmem_limit_bytes=VMEM_LIMIT),
        cost_estimate=cost,
    )(qkv5, qkv5, qkv5, mask_bias)


# --------------------------- BERT encoder layer --------------------------------

def bert_layer(h2d, mask_bias, lp, B, S, nH, dh):
    H = nH * dh
    # Fused QKV projection: one matmul against [H, 3H].
    qkv = linear(h2d, lp["wqkv"], lp["bqkv"])          # [B*S, 3H] bf16
    qkv5 = qkv.reshape(B, S, 3, nH, dh)                # free (contiguous) reshape

    ctx = mha_attention(qkv5, mask_bias, scale=1.0 / math.sqrt(dh))   # [B,S,nH,dh]
    ctx2d = ctx.reshape(B * S, H)                      # free reshape

    # Output projection + residual + LayerNorm fused into one kernel.
    h1 = linear_add_ln(ctx2d, lp["wo"], lp["bo"], h2d, lp["ln1_g"], lp["ln1_b"])

    ff = linear(h1, lp["w1"], lp["b1"], activation="gelu")
    # FFN down projection + residual + LayerNorm fused.
    return linear_add_ln(ff, lp["w2"], lp["b2"], h1, lp["ln2_g"], lp["ln2_b"])


# --------------------------- CRF (torchcrf semantics, reduction='sum') ---------
# TODO(synk): CRF recursion kept in plain JAX (lax.scan) -- num_tags=5 is far below the
#             (8,128) TPU tile and would be pure padding overhead as a Pallas kernel.

def crf_log_likelihood(emissions, tags, mask, start, end, trans):
    B, S, L = emissions.shape
    bidx = jnp.arange(B)

    # numerator: score of the gold tag sequence
    score = start[tags[:, 0]] + emissions[bidx, 0, tags[:, 0]]

    def num_step(carry, t):
        prev_tag = tags[bidx, t - 1]
        cur_tag = tags[bidx, t]
        step = trans[prev_tag, cur_tag] + emissions[bidx, t, cur_tag]
        return carry + step * mask[:, t], None

    score, _ = lax.scan(num_step, score, jnp.arange(1, S))
    seq_ends = jnp.sum(mask, axis=1).astype(jnp.int32) - 1
    last_tags = tags[bidx, seq_ends]
    score = score + end[last_tags]

    # denominator: log partition via the forward algorithm
    alpha = start[None, :] + emissions[:, 0, :]

    def den_step(alpha, t):
        em_t = lax.dynamic_index_in_dim(emissions, t, axis=1, keepdims=False)
        new = jax.nn.logsumexp(alpha[:, :, None] + trans[None, :, :] + em_t[:, None, :],
                               axis=1)
        m_t = mask[:, t][:, None]
        return jnp.where(m_t > 0, new, alpha), None

    alpha, _ = lax.scan(den_step, alpha, jnp.arange(1, S))
    log_z = jax.nn.logsumexp(alpha + end[None, :], axis=1)
    return jnp.sum(score - log_z)          # reduction='sum'


# --------------------------- Full forward --------------------------------------

def bert_crf_forward(params, cfg, input_ids, token_type_ids=None,
                     attention_mask=None, labels=None):
    B, S = input_ids.shape
    H = cfg["hidden_size"]
    nH = cfg["num_heads"]
    dh = H // nH
    L = cfg["num_labels"]

    if token_type_ids is None:
        token_type_ids = jnp.zeros_like(input_ids)
    if attention_mask is None:
        attention_mask = jnp.ones_like(input_ids)
    mask_f = attention_mask.astype(jnp.float32)
    mask_bias = ((1.0 - mask_f) * (-1e9)).reshape(B, 1, S)    # shared across heads

    emb = (params["word_emb"][input_ids]
           + params["pos_emb"][:S][None, :, :]
           + params["type_emb"][token_type_ids])
    h = layernorm(emb.reshape(B * S, H), params["emb_ln_g"], params["emb_ln_b"])

    for lp in params["layers"]:
        h = bert_layer(h, mask_bias, lp, B, S, nH, dh)

    # nn.Dropout in eval mode == identity (deterministic forward).
    # Classifier: weight is pre-padded (at init) to a lane-dense 128-wide matrix;
    # single-step grid over M, f32 lane-dense store, sliced to num_labels outside.
    logits = linear(h, params["cls_w_pad"], params["cls_b_pad"],
                    out_dtype=jnp.float32)[:, :L]
    logits = logits.reshape(B, S, L)

    if labels is None:
        return (logits,)

    llh = crf_log_likelihood(logits, labels, mask_f,
                             params["crf_start"], params["crf_end"],
                             params["crf_trans"])
    return (-1.0 * llh, logits)


# --------------------------- Deterministic parameter init ----------------------

def init_params(key, cfg):
    H = cfg["hidden_size"]
    I = cfg["intermediate_size"]
    num_labels = cfg["num_labels"]
    Lp = ((num_labels + 127) // 128) * 128

    def nrm(k, shape, scale=0.02, dtype=jnp.float32):
        return (scale * jax.random.normal(k, shape)).astype(dtype)

    keys = iter(jax.random.split(key, 256))

    cls_w = nrm(next(keys), (H, num_labels))
    cls_w_pad = (jnp.zeros((H, Lp), jnp.float32).at[:, :num_labels].set(cls_w)
                 .astype(jnp.bfloat16))                    # padded + bf16 once, here
    cls_b_pad = jnp.zeros((Lp,), jnp.float32)

    params = {
        "word_emb": nrm(next(keys), (cfg["vocab_size"], H)),
        "pos_emb": nrm(next(keys), (cfg["max_position"], H)),
        "type_emb": nrm(next(keys), (cfg["type_vocab"], H)),
        "emb_ln_g": jnp.ones((H,), jnp.float32),
        "emb_ln_b": jnp.zeros((H,), jnp.float32),
        "layers": [],
        "cls_w_pad": cls_w_pad,
        "cls_b_pad": cls_b_pad,
        "crf_start": nrm(next(keys), (num_labels,), 0.1),
        "crf_end": nrm(next(keys), (num_labels,), 0.1),
        "crf_trans": nrm(next(keys), (num_labels, num_labels), 0.1),
    }
    # Encoder weights stored in bf16 (MXU operand dtype) -- no per-forward casts.
    for _ in range(cfg["num_layers"]):
        lp = {
            "wqkv": nrm(next(keys), (H, 3 * H), dtype=jnp.bfloat16),
            "bqkv": jnp.zeros((3 * H,), jnp.float32),
            "wo": nrm(next(keys), (H, H), dtype=jnp.bfloat16),
            "bo": jnp.zeros((H,), jnp.float32),
            "ln1_g": jnp.ones((H,), jnp.float32), "ln1_b": jnp.zeros((H,), jnp.float32),
            "w1": nrm(next(keys), (H, I), dtype=jnp.bfloat16),
            "b1": jnp.zeros((I,), jnp.float32),
            "w2": nrm(next(keys), (I, H), dtype=jnp.bfloat16),
            "b2": jnp.zeros((H,), jnp.float32),
            "ln2_g": jnp.ones((H,), jnp.float32), "ln2_b": jnp.zeros((H,), jnp.float32),
        }
        params["layers"].append(lp)
    return params


# --------------------------- Main -----------------------------------------------

if __name__ == "__main__":
    cfg = dict(
        vocab_size=100,
        hidden_size=32,
        num_heads=4,
        intermediate_size=64,
        num_layers=2,
        max_position=16,
        type_vocab=2,
        num_labels=5,
        hidden_dropout_prob=0.1,   # identity in eval-mode forward
    )
    B, S = 2, 8

    params = init_params(jax.random.PRNGKey(0), cfg)

    k1, k2, k3 = jax.random.split(jax.random.PRNGKey(0), 3)
    input_ids = jax.random.randint(k1, (B, S), 0, cfg["vocab_size"], dtype=jnp.int32)
    token_type_ids = jnp.zeros((B, S), jnp.int32)
    attention_mask = jnp.ones((B, S), jnp.int32).at[1, 6:].set(0)   # some padding
    labels = jax.random.randint(k3, (B, S), 0, cfg["num_labels"], dtype=jnp.int32)

    @jax.jit
    def fwd_with_labels(p, ids, tt, am, lb):
        return bert_crf_forward(p, cfg, ids, tt, am, lb)

    @jax.jit
    def fwd_logits(p, ids, tt, am):
        return bert_crf_forward(p, cfg, ids, tt, am)

    nll, logits = fwd_with_labels(params, input_ids, token_type_ids,
                                  attention_mask, labels)
    (logits_only,) = fwd_logits(params, input_ids, token_type_ids, attention_mask)

    jax.block_until_ready((nll, logits, logits_only))
    assert logits.shape == (B, S, cfg["num_labels"])
    assert nll.shape == ()
    print("KERNEL_OK")
</pallas_src>

<mosaic_0001>
module attributes {stable_mosaic.version = 11 : i64} {
  func.func @_ln_kernel(%arg0: i32, %arg1: memref<16x32xf32, #tpu.memory_space<vmem>>, %arg2: memref<1x32xf32, #tpu.memory_space<vmem>>, %arg3: memref<1x32xf32, #tpu.memory_space<vmem>>, %arg4: memref<16x32xbf16, #tpu.memory_space<vmem>>) attributes {dimension_semantics = [#tpu.dimension_semantics<parallel>], iteration_bounds = array<i64: 1>, scalar_prefetch = 0 : i64, scratch_operands = 0 : i64, tpu.core_type = #tpu.core_type<tc>, window_params = [{transform_indices = @transform_0, window_bounds = array<i64: 16, 32>}, {pipeline_mode = #tpu.pipeline_mode<synchronous>, transform_indices = @transform_1, window_bounds = array<i64: 1, 32>}, {pipeline_mode = #tpu.pipeline_mode<synchronous>, transform_indices = @transform_2, window_bounds = array<i64: 1, 32>}, {transform_indices = @transform_3, window_bounds = array<i64: 16, 32>}]} {
    %c0 = arith.constant 0 : index
    %c0_0 = arith.constant 0 : index
    %0 = vector.load %arg1[%c0, %c0_0] : memref<16x32xf32, #tpu.memory_space<vmem>>, vector<16x32xf32>
    %cst = arith.constant dense<0.000000e+00> : vector<16xf32>
    %1 = vector.multi_reduction <add>, %0, %cst [1] : vector<16x32xf32> to vector<16xf32>
    %2 = vector.shape_cast %1 : vector<16xf32> to vector<16x1xf32>
    %cst_1 = arith.constant 3.200000e+01 : f32
    %3 = vector.broadcast %cst_1 : f32 to vector<16x1xf32>
    %4 = arith.divf %2, %3 : vector<16x1xf32>
    %5 = vector.broadcast %4 : vector<16x1xf32> to vector<16x32xf32>
    %6 = arith.subf %0, %5 : vector<16x32xf32>
    %7 = arith.mulf %6, %6 : vector<16x32xf32>
    %cst_2 = arith.constant dense<0.000000e+00> : vector<16xf32>
    %8 = vector.multi_reduction <add>, %7, %cst_2 [1] : vector<16x32xf32> to vector<16xf32>
    %9 = vector.shape_cast %8 : vector<16xf32> to vector<16x1xf32>
    %cst_3 = arith.constant 3.200000e+01 : f32
    %10 = vector.broadcast %cst_3 : f32 to vector<16x1xf32>
    %11 = arith.divf %9, %10 : vector<16x1xf32>
    %12 = vector.broadcast %4 : vector<16x1xf32> to vector<16x32xf32>
    %13 = arith.subf %0, %12 : vector<16x32xf32>
    %cst_4 = arith.constant 9.99999996E-13 : f32
    %14 = vector.broadcast %cst_4 : f32 to vector<16x1xf32>
    %15 = arith.addf %11, %14 : vector<16x1xf32>
    %16 = math.rsqrt %15 : vector<16x1xf32>
    %17 = vector.broadcast %16 : vector<16x1xf32> to vector<16x32xf32>
    %18 = arith.mulf %13, %17 : vector<16x32xf32>
    %c0_5 = arith.constant 0 : index
    %c0_6 = arith.constant 0 : index
    %19 = vector.load %arg2[%c0_5, %c0_6] : memref<1x32xf32, #tpu.memory_space<vmem>>, vector<1x32xf32>
    %20 = vector.broadcast %19 : vector<1x32xf32> to vector<16x32xf32>
    %21 = arith.mulf %18, %20 : vector<16x32xf32>
    %c0_7 = arith.constant 0 : index
    %c0_8 = arith.constant 0 : index
    %22 = vector.load %arg3[%c0_7, %c0_8] : memref<1x32xf32, #tpu.memory_space<vmem>>, vector<1x32xf32>
    %23 = vector.broadcast %22 : vector<1x32xf32> to vector<16x32xf32>
    %24 = arith.addf %21, %23 : vector<16x32xf32>
    %25 = arith.truncf %24 : vector<16x32xf32> to vector<16x32xbf16>
    %c0_9 = arith.constant 0 : index
    %c0_10 = arith.constant 0 : index
    %26 = vector.load %arg4[%c0_9, %c0_10] : memref<16x32xbf16, #tpu.memory_space<vmem>>, vector<16x32xbf16>
    tpu.vector_store %arg4[%c0_9, %c0_10], %25 {strides = array<i32>} : memref<16x32xbf16, #tpu.memory_space<vmem>>, vector<16x32xbf16>,
    return
  }
  func.func @transform_0(%arg0: i32) -> (i32, i32) {
    %c0_i32 = arith.constant 0 : i32
    %c0_i32_0 = arith.constant 0 : i32
    return %arg0, %c0_i32 : i32, i32
  }
  func.func @transform_1(%arg0: i32) -> (i32, i32) {
    %c0_i32 = arith.constant 0 : i32
    %c0_i32_0 = arith.constant 0 : i32
    %c0_i32_1 = arith.constant 0 : i32
    return %c0_i32, %c0_i32_0 : i32, i32
  }
  func.func @transform_2(%arg0: i32) -> (i32, i32) {
    %c0_i32 = arith.constant 0 : i32
    %c0_i32_0 = arith.constant 0 : i32
    %c0_i32_1 = arith.constant 0 : i32
    return %c0_i32, %c0_i32_0 : i32, i32
  }
  func.func @transform_3(%arg0: i32) -> (i32, i32) {
    %c0_i32 = arith.constant 0 : i32
    %c0_i32_0 = arith.constant 0 : i32
    return %arg0, %c0_i32 : i32, i32
  }
}

module attributes {stable_mosaic.version = 11 : i64} {
  func.func @_linear_kernel(%arg0: i32, %arg1: memref<16x32xbf16, #tpu.memory_space<vmem>>, %arg2: memref<32x96xbf16, #tpu.memory_space<vmem>>, %arg3: memref<1x96xf32, #tpu.memory_space<vmem>>, %arg4: memref<16x96xbf16, #tpu.memory_space<vmem>>) attributes {dimension_semantics = [#tpu.dimension_semantics<parallel>], iteration_bounds = array<i64: 1>, scalar_prefetch = 0 : i64, scratch_operands = 0 : i64, tpu.core_type = #tpu.core_type<tc>, window_params = [{transform_indices = @transform_0, window_bounds = array<i64: 16, 32>}, {pipeline_mode = #tpu.pipeline_mode<synchronous>, transform_indices = @transform_1, window_bounds = array<i64: 32, 96>}, {pipeline_mode = #tpu.pipeline_mode<synchronous>, transform_indices = @transform_2, window_bounds = array<i64: 1, 96>}, {transform_indices = @transform_3, window_bounds = array<i64: 16, 96>}]} {
    %c0 = arith.constant 0 : index
    %c0_0 = arith.constant 0 : index
    %0 = vector.load %arg1[%c0, %c0_0] : memref<16x32xbf16, #tpu.memory_space<vmem>>, vector<16x32xbf16>
    %c0_1 = arith.constant 0 : index
    %c0_2 = arith.constant 0 : index
    %1 = vector.load %arg2[%c0_1, %c0_2] : memref<32x96xbf16, #tpu.memory_space<vmem>>, vector<32x96xbf16>
    %cst = arith.constant dense<0.000000e+00> : vector<16x96xf32>
    %2 = tpu.matmul %0, %1, %cst {dimension_numbers = #tpu.dot_dimension_numbers<[1], [0], [0], [1], [0, 0, 1, 1], [], []>} : vector<16x32xbf16>, vector<32x96xbf16>, vector<16x96xf32> -> vector<16x96xf32>
    %c0_3 = arith.constant 0 : index
    %c0_4 = arith.constant 0 : index
    %3 = vector.load %arg3[%c0_3, %c0_4] : memref<1x96xf32, #tpu.memory_space<vmem>>, vector<1x96xf32>
    %4 = vector.broadcast %3 : vector<1x96xf32> to vector<16x96xf32>
    %5 = arith.addf %2, %4 : vector<16x96xf32>
    %6 = arith.truncf %5 : vector<16x96xf32> to vector<16x96xbf16>
    %c0_5 = arith.constant 0 : index
    %c0_6 = arith.constant 0 : index
    %7 = vector.load %arg4[%c0_5, %c0_6] : memref<16x96xbf16, #tpu.memory_space<vmem>>, vector<16x96xbf16>
    tpu.vector_store %arg4[%c0_5, %c0_6], %6 {strides = array<i32>} : memref<16x96xbf16, #tpu.memory_space<vmem>>, vector<16x96xbf16>,
    return
  }
  func.func @transform_0(%arg0: i32) -> (i32, i32) {
    %c0_i32 = arith.constant 0 : i32
    %c0_i32_0 = arith.constant 0 : i32
    return %arg0, %c0_i32 : i32, i32
  }
  func.func @transform_1(%arg0: i32) -> (i32, i32) {
    %c0_i32 = arith.constant 0 : i32
    %c0_i32_0 = arith.constant 0 : i32
    %c0_i32_1 = arith.constant 0 : i32
    return %c0_i32, %c0_i32_0 : i32, i32
  }
  func.func @transform_2(%arg0: i32) -> (i32, i32) {
    %c0_i32 = arith.constant 0 : i32
    %c0_i32_0 = arith.constant 0 : i32
    %c0_i32_1 = arith.constant 0 : i32
    return %c0_i32, %c0_i32_0 : i32, i32
  }
  func.func @transform_3(%arg0: i32) -> (i32, i32) {
    %c0_i32 = arith.constant 0 : i32
    %c0_i32_0 = arith.constant 0 : i32
    return %arg0, %c0_i32 : i32, i32
  }
}

module attributes {stable_mosaic.version = 11 : i64} {
  func.func @_linear_res_ln_kernel(%arg0: i32, %arg1: memref<16x32xbf16, #tpu.memory_space<vmem>>, %arg2: memref<32x32xbf16, #tpu.memory_space<vmem>>, %arg3: memref<1x32xf32, #tpu.memory_space<vmem>>, %arg4: memref<16x32xbf16, #tpu.memory_space<vmem>>, %arg5: memref<1x32xf32, #tpu.memory_space<vmem>>, %arg6: memref<1x32xf32, #tpu.memory_space<vmem>>, %arg7: memref<16x32xbf16, #tpu.memory_space<vmem>>) attributes {dimension_semantics = [#tpu.dimension_semantics<parallel>], iteration_bounds = array<i64: 1>, scalar_prefetch = 0 : i64, scratch_operands = 0 : i64, tpu.core_type = #tpu.core_type<tc>, window_params = [{transform_indices = @transform_0, window_bounds = array<i64: 16, 32>}, {pipeline_mode = #tpu.pipeline_mode<synchronous>, transform_indices = @transform_1, window_bounds = array<i64: 32, 32>}, {pipeline_mode = #tpu.pipeline_mode<synchronous>, transform_indices = @transform_2, window_bounds = array<i64: 1, 32>}, {transform_indices = @transform_3, window_bounds = array<i64: 16, 32>}, {pipeline_mode = #tpu.pipeline_mode<synchronous>, transform_indices = @transform_4, window_bounds = array<i64: 1, 32>}, {pipeline_mode = #tpu.pipeline_mode<synchronous>, transform_indices = @transform_5, window_bounds = array<i64: 1, 32>}, {transform_indices = @transform_6, window_bounds = array<i64: 16, 32>}]} {
    %c0 = arith.constant 0 : index
    %c0_0 = arith.constant 0 : index
    %0 = vector.load %arg1[%c0, %c0_0] : memref<16x32xbf16, #tpu.memory_space<vmem>>, vector<16x32xbf16>
    %c0_1 = arith.constant 0 : index
    %c0_2 = arith.constant 0 : index
    %1 = vector.load %arg2[%c0_1, %c0_2] : memref<32x32xbf16, #tpu.memory_space<vmem>>, vector<32x32xbf16>
    %cst = arith.constant dense<0.000000e+00> : vector<16x32xf32>
    %2 = tpu.matmul %0, %1, %cst {dimension_numbers = #tpu.dot_dimension_numbers<[1], [0], [0], [1], [0, 0, 1, 1], [], []>} : vector<16x32xbf16>, vector<32x32xbf16>, vector<16x32xf32> -> vector<16x32xf32>
    %c0_3 = arith.constant 0 : index
    %c0_4 = arith.constant 0 : index
    %3 = vector.load %arg3[%c0_3, %c0_4] : memref<1x32xf32, #tpu.memory_space<vmem>>, vector<1x32xf32>
    %4 = vector.broadcast %3 : vector<1x32xf32> to vector<16x32xf32>
    %5 = arith.addf %2, %4 : vector<16x32xf32>
    %c0_5 = arith.constant 0 : index
    %c0_6 = arith.constant 0 : index
    %6 = vector.load %arg4[%c0_5, %c0_6] : memref<16x32xbf16, #tpu.memory_space<vmem>>, vector<16x32xbf16>
    %7 = arith.extf %6 : vector<16x32xbf16> to vector<16x32xf32>
    %8 = arith.addf %5, %7 : vector<16x32xf32>
    %cst_7 = arith.constant dense<0.000000e+00> : vector<16xf32>
    %9 = vector.multi_reduction <add>, %8, %cst_7 [1] : vector<16x32xf32> to vector<16xf32>
    %10 = vector.shape_cast %9 : vector<16xf32> to vector<16x1xf32>
    %cst_8 = arith.constant 3.200000e+01 : f32
    %11 = vector.broadcast %cst_8 : f32 to vector<16x1xf32>
    %12 = arith.divf %10, %11 : vector<16x1xf32>
    %13 = vector.broadcast %12 : vector<16x1xf32> to vector<16x32xf32>
    %14 = arith.subf %8, %13 : vector<16x32xf32>
    %15 = arith.mulf %14, %14 : vector<16x32xf32>
    %cst_9 = arith.constant dense<0.000000e+00> : vector<16xf32>
    %16 = vector.multi_reduction <add>, %15, %cst_9 [1] : vector<16x32xf32> to vector<16xf32>
    %17 = vector.shape_cast %16 : vector<16xf32> to vector<16x1xf32>
    %cst_10 = arith.constant 3.200000e+01 : f32
    %18 = vector.broadcast %cst_10 : f32 to vector<16x1xf32>
    %19 = arith.divf %17, %18 : vector<16x1xf32>
    %20 = vector.broadcast %12 : vector<16x1xf32> to vector<16x32xf32>
    %21 = arith.subf %8, %20 : vector<16x32xf32>
    %cst_11 = arith.constant 9.99999996E-13 : f32
    %22 = vector.broadcast %cst_11 : f32 to vector<16x1xf32>
    %23 = arith.addf %19, %22 : vector<16x1xf32>
    %24 = math.rsqrt %23 : vector<16x1xf32>
    %25 = vector.broadcast %24 : vector<16x1xf32> to vector<16x32xf32>
    %26 = arith.mulf %21, %25 : vector<16x32xf32>
    %c0_12 = arith.constant 0 : index
    %c0_13 = arith.constant 0 : index
    %27 = vector.load %arg5[%c0_12, %c0_13] : memref<1x32xf32, #tpu.memory_space<vmem>>, vector<1x32xf32>
    %28 = vector.broadcast %27 : vector<1x32xf32> to vector<16x32xf32>
    %29 = arith.mulf %26, %28 : vector<16x32xf32>
    %c0_14 = arith.constant 0 : index
    %c0_15 = arith.constant 0 : index
    %30 = vector.load %arg6[%c0_14, %c0_15] : memref<1x32xf32, #tpu.memory_space<vmem>>, vector<1x32xf32>
    %31 = vector.broadcast %30 : vector<1x32xf32> to vector<16x32xf32>
    %32 = arith.addf %29, %31 : vector<16x32xf32>
    %33 = arith.truncf %32 : vector<16x32xf32> to vector<16x32xbf16>
    %c0_16 = arith.constant 0 : index
    %c0_17 = arith.constant 0 : index
    %34 = vector.load %arg7[%c0_16, %c0_17] : memref<16x32xbf16, #tpu.memory_space<vmem>>, vector<16x32xbf16>
    tpu.vector_store %arg7[%c0_16, %c0_17], %33 {strides = array<i32>} : memref<16x32xbf16, #tpu.memory_space<vmem>>, vector<16x32xbf16>,
    return
  }
  func.func @transform_0(%arg0: i32) -> (i32, i32) {
    %c0_i32 = arith.constant 0 : i32
    %c0_i32_0 = arith.constant 0 : i32
    return %arg0, %c0_i32 : i32, i32
  }
  func.func @transform_1(%arg0: i32) -> (i32, i32) {
    %c0_i32 = arith.constant 0 : i32
    %c0_i32_0 = arith.constant 0 : i32
    %c0_i32_1 = arith.constant 0 : i32
    return %c0_i32, %c0_i32_0 : i32, i32
  }
  func.func @transform_2(%arg0: i32) -> (i32, i32) {
    %c0_i32 = arith.constant 0 : i32
    %c0_i32_0 = arith.constant 0 : i32
    %c0_i32_1 = arith.constant 0 : i32
    return %c0_i32, %c0_i32_0 : i32, i32
  }
  func.func @transform_3(%arg0: i32) -> (i32, i32) {
    %c0_i32 = arith.constant 0 : i32
    %c0_i32_0 = arith.constant 0 : i32
    return %arg0, %c0_i32 : i32, i32
  }
  func.func @transform_4(%arg0: i32) -> (i32, i32) {
    %c0_i32 = arith.constant 0 : i32
    %c0_i32_0 = arith.constant 0 : i32
    %c0_i32_1 = arith.constant 0 : i32
    return %c0_i32, %c0_i32_0 : i32, i32
  }
  func.func @transform_5(%arg0: i32) -> (i32, i32) {
    %c0_i32 = arith.constant 0 : i32
    %c0_i32_0 = arith.constant 0 : i32
    %c0_i32_1 = arith.constant 0 : i32
    return %c0_i32, %c0_i32_0 : i32, i32
  }
  func.func @transform_6(%arg0: i32) -> (i32, i32) {
    %c0_i32 = arith.constant 0 : i32
    %c0_i32_0 = arith.constant 0 : i32
    return %arg0, %c0_i32 : i32, i32
  }
}

module attributes {stable_mosaic.version = 11 : i64} {
  func.func @_attn_kernel(%arg0: i32, %arg1: i32, %arg2: memref<1x8x1x4x8xbf16, #tpu.memory_space<vmem>>, %arg3: memref<1x8x1x4x8xbf16, #tpu.memory_space<vmem>>, %arg4: memref<1x8x1x4x8xbf16, #tpu.memory_space<vmem>>, %arg5: memref<1x1x8xf32, #tpu.memory_space<vmem>>, %arg6: memref<1x8x4x8xbf16, #tpu.memory_space<vmem>>) attributes {dimension_semantics = [#tpu.dimension_semantics<parallel>, #tpu.dimension_semantics<parallel>], iteration_bounds = array<i64: 2, 1>, scalar_prefetch = 0 : i64, scratch_operands = 0 : i64, tpu.core_type = #tpu.core_type<tc>, window_params = [{transform_indices = @transform_0, window_bounds = array<i64: 1, 8, 1, 4, 8>}, {transform_indices = @transform_1, window_bounds = array<i64: 1, 8, 1, 4, 8>}, {transform_indices = @transform_2, window_bounds = array<i64: 1, 8, 1, 4, 8>}, {transform_indices = @transform_3, window_bounds = array<i64: 1, 1, 8>}, {transform_indices = @transform_4, window_bounds = array<i64: 1, 8, 4, 8>}]} {
    %c0 = arith.constant 0 : index
    %c0_0 = arith.constant 0 : index
    %c0_1 = arith.constant 0 : index
    %0 = vector.load %arg5[%c0, %c0_0, %c0_1] : memref<1x1x8xf32, #tpu.memory_space<vmem>>, vector<1x1x8xf32>
    %1 = vector.shape_cast %0 : vector<1x1x8xf32> to vector<1x8xf32>
    %c0_2 = arith.constant 0 : index
    %c0_3 = arith.constant 0 : index
    %c0_4 = arith.constant 0 : index
    %c0_5 = arith.constant 0 : index
    %c0_6 = arith.constant 0 : index
    %2 = vector.load %arg2[%c0_2, %c0_3, %c0_4, %c0_5, %c0_6] : memref<1x8x1x4x8xbf16, #tpu.memory_space<vmem>>, vector<1x8x1x1x8xbf16>
    %3 = vector.shape_cast %2 : vector<1x8x1x1x8xbf16> to vector<8x8xbf16>
    %cst = arith.constant 3.535160e-01 : bf16
    %4 = vector.broadcast %cst : bf16 to vector<8x8xbf16>
    %5 = arith.mulf %3, %4 : vector<8x8xbf16>
    %c0_7 = arith.constant 0 : index
    %c0_8 = arith.constant 0 : index
    %c0_9 = arith.constant 0 : index
    %c0_10 = arith.constant 0 : index
    %c0_11 = arith.constant 0 : index
    %6 = vector.load %arg3[%c0_7, %c0_8, %c0_9, %c0_10, %c0_11] : memref<1x8x1x4x8xbf16, #tpu.memory_space<vmem>>, vector<1x8x1x1x8xbf16>
    %7 = vector.shape_cast %6 : vector<1x8x1x1x8xbf16> to vector<8x8xbf16>
    %c0_12 = arith.constant 0 : index
    %c0_13 = arith.constant 0 : index
    %c0_14 = arith.constant 0 : index
    %c0_15 = arith.constant 0 : index
    %c0_16 = arith.constant 0 : index
    %8 = vector.load %arg4[%c0_12, %c0_13, %c0_14, %c0_15, %c0_16] : memref<1x8x1x4x8xbf16, #tpu.memory_space<vmem>>, vector<1x8x1x1x8xbf16>
    %9 = vector.shape_cast %8 : vector<1x8x1x1x8xbf16> to vector<8x8xbf16>
    %cst_17 = arith.constant dense<0.000000e+00> : vector<8x8xf32>
    %10 = tpu.matmul %5, %7, %cst_17 {dimension_numbers = #tpu.dot_dimension_numbers<[1], [1], [0], [0], [0, 0, 1, 0], [], []>} : vector<8x8xbf16>, vector<8x8xbf16>, vector<8x8xf32> -> vector<8x8xf32>
    %11 = vector.broadcast %1 : vector<1x8xf32> to vector<8x8xf32>
    %12 = arith.addf %10, %11 : vector<8x8xf32>
    %cst_18 = arith.constant dense<0xFF800000> : vector<8xf32>
    %13 = vector.multi_reduction <maximumf>, %12, %cst_18 [1] : vector<8x8xf32> to vector<8xf32>
    %14 = vector.shape_cast %13 : vector<8xf32> to vector<8x1xf32>
    %15 = vector.broadcast %14 : vector<8x1xf32> to vector<8x8xf32>
    %16 = arith.subf %12, %15 : vector<8x8xf32>
    %17 = math.exp %16 : vector<8x8xf32>
    %cst_19 = arith.constant dense<0.000000e+00> : vector<8xf32>
    %18 = vector.multi_reduction <add>, %17, %cst_19 [1] : vector<8x8xf32> to vector<8xf32>
    %19 = vector.shape_cast %18 : vector<8xf32> to vector<8x1xf32>
    %20 = tpu.reciprocal %19 {approx = true} : vector<8x1xf32> -> vector<8x1xf32>
    %21 = vector.broadcast %20 : vector<8x1xf32> to vector<8x8xf32>
    %22 = arith.mulf %17, %21 : vector<8x8xf32>
    %23 = arith.truncf %22 : vector<8x8xf32> to vector<8x8xbf16>
    %cst_20 = arith.constant dense<0.000000e+00> : vector<8x8xf32>
    %24 = tpu.matmul %23, %9, %cst_20 {dimension_numbers = #tpu.dot_dimension_numbers<[1], [0], [0], [1], [0, 0, 1, 1], [], []>} : vector<8x8xbf16>, vector<8x8xbf16>, vector<8x8xf32> -> vector<8x8xf32>
    %25 = arith.truncf %24 : vector<8x8xf32> to vector<8x8xbf16>
    %c0_21 = arith.constant 0 : index
    %c0_22 = arith.constant 0 : index
    %c0_23 = arith.constant 0 : index
    %c0_24 = arith.constant 0 : index
    %26 = vector.load %arg6[%c0_21, %c0_22, %c0_23, %c0_24] : memref<1x8x4x8xbf16, #tpu.memory_space<vmem>>, vector<1x8x1x8xbf16>
    %27 = vector.shape_cast %26 : vector<1x8x1x8xbf16> to vector<8x8xbf16>
    %28 = vector.shape_cast %25 : vector<8x8xbf16> to vector<1x8x1x8xbf16>
    tpu.vector_store %arg6[%c0_21, %c0_22, %c0_23, %c0_24], %28 {strides = array<i32>} : memref<1x8x4x8xbf16, #tpu.memory_space<vmem>>, vector<1x8x1x8xbf16>,
    %c0_25 = arith.constant 0 : index
    %c0_26 = arith.constant 0 : index
    %c0_27 = arith.constant 0 : index
    %c1 = arith.constant 1 : index
    %c0_28 = arith.constant 0 : index
    %29 = vector.load %arg2[%c0_25, %c0_26, %c0_27, %c1, %c0_28] : memref<1x8x1x4x8xbf16, #tpu.memory_space<vmem>>, vector<1x8x1x1x8xbf16>
    %30 = vector.shape_cast %29 : vector<1x8x1x1x8xbf16> to vector<8x8xbf16>
    %cst_29 = arith.constant 3.535160e-01 : bf16
    %31 = vector.broadcast %cst_29 : bf16 to vector<8x8xbf16>
    %32 = arith.mulf %30, %31 : vector<8x8xbf16>
    %c0_30 = arith.constant 0 : index
    %c0_31 = arith.constant 0 : index
    %c0_32 = arith.constant 0 : index
    %c1_33 = arith.constant 1 : index
    %c0_34 = arith.constant 0 : index
    %33 = vector.load %arg3[%c0_30, %c0_31, %c0_32, %c1_33, %c0_34] : memref<1x8x1x4x8xbf16, #tpu.memory_space<vmem>>, vector<1x8x1x1x8xbf16>
    %34 = vector.shape_cast %33 : vector<1x8x1x1x8xbf16> to vector<8x8xbf16>
    %c0_35 = arith.constant 0 : index
    %c0_36 = arith.constant 0 : index
    %c0_37 = arith.constant 0 : index
    %c1_38 = arith.constant 1 : index
    %c0_39 = arith.constant 0 : index
    %35 = vector.load %arg4[%c0_35, %c0_36, %c0_37, %c1_38, %c0_39] : memref<1x8x1x4x8xbf16, #tpu.memory_space<vmem>>, vector<1x8x1x1x8xbf16>
    %36 = vector.shape_cast %35 : vector<1x8x1x1x8xbf16> to vector<8x8xbf16>
    %cst_40 = arith.constant dense<0.000000e+00> : vector<8x8xf32>
    %37 = tpu.matmul %32, %34, %cst_40 {dimension_numbers = #tpu.dot_dimension_numbers<[1], [1], [0], [0], [0, 0, 1, 0], [], []>} : vector<8x8xbf16>, vector<8x8xbf16>, vector<8x8xf32> -> vector<8x8xf32>
    %38 = vector.broadcast %1 : vector<1x8xf32> to vector<8x8xf32>
    %39 = arith.addf %37, %38 : vector<8x8xf32>
    %cst_41 = arith.constant dense<0xFF800000> : vector<8xf32>
    %40 = vector.multi_reduction <maximumf>, %39, %cst_41 [1] : vector<8x8xf32> to vector<8xf32>
    %41 = vector.shape_cast %40 : vector<8xf32> to vector<8x1xf32>
    %42 = vector.broadcast %41 : vector<8x1xf32> to vector<8x8xf32>
    %43 = arith.subf %39, %42 : vector<8x8xf32>
    %44 = math.exp %43 : vector<8x8xf32>
    %cst_42 = arith.constant dense<0.000000e+00> : vector<8xf32>
    %45 = vector.multi_reduction <add>, %44, %cst_42 [1] : vector<8x8xf32> to vector<8xf32>
    %46 = vector.shape_cast %45 : vector<8xf32> to vector<8x1xf32>
    %47 = tpu.reciprocal %46 {approx = true} : vector<8x1xf32> -> vector<8x1xf32>
    %48 = vector.broadcast %47 : vector<8x1xf32> to vector<8x8xf32>
    %49 = arith.mulf %44, %48 : vector<8x8xf32>
    %50 = arith.truncf %49 : vector<8x8xf32> to vector<8x8xbf16>
    %cst_43 = arith.constant dense<0.000000e+00> : vector<8x8xf32>
    %51 = tpu.matmul %50, %36, %cst_43 {dimension_numbers = #tpu.dot_dimension_numbers<[1], [0], [0], [1], [0, 0, 1, 1], [], []>} : vector<8x8xbf16>, vector<8x8xbf16>, vector<8x8xf32> -> vector<8x8xf32>
    %52 = arith.truncf %51 : vector<8x8xf32> to vector<8x8xbf16>
    %c0_44 = arith.constant 0 : index
    %c0_45 = arith.constant 0 : index
    %c1_46 = arith.constant 1 : index
    %c0_47 = arith.constant 0 : index
    %53 = vector.load %arg6[%c0_44, %c0_45, %c1_46, %c0_47] : memref<1x8x4x8xbf16, #tpu.memory_space<vmem>>, vector<1x8x1x8xbf16>
    %54 = vector.shape_cast %53 : vector<1x8x1x8xbf16> to vector<8x8xbf16>
    %55 = vector.shape_cast %52 : vector<8x8xbf16> to vector<1x8x1x8xbf16>
    tpu.vector_store %arg6[%c0_44, %c0_45, %c1_46, %c0_47], %55 {strides = array<i32>} : memref<1x8x4x8xbf16, #tpu.memory_space<vmem>>, vector<1x8x1x8xbf16>,
    %c0_48 = arith.constant 0 : index
    %c0_49 = arith.constant 0 : index
    %c0_50 = arith.constant 0 : index
    %c2 = arith.constant 2 : index
    %c0_51 = arith.constant 0 : index
    %56 = vector.load %arg2[%c0_48, %c0_49, %c0_50, %c2, %c0_51] : memref<1x8x1x4x8xbf16, #tpu.memory_space<vmem>>, vector<1x8x1x1x8xbf16>
    %57 = vector.shape_cast %56 : vector<1x8x1x1x8xbf16> to vector<8x8xbf16>
    %cst_52 = arith.constant 3.535160e-01 : bf16
    %58 = vector.broadcast %cst_52 : bf16 to vector<8x8xbf16>
    %59 = arith.mulf %57, %58 : vector<8x8xbf16>
    %c0_53 = arith.constant 0 : index
    %c0_54 = arith.constant 0 : index
    %c0_55 = arith.constant 0 : index
    %c2_56 = arith.constant 2 : index
    %c0_57 = arith.constant 0 : index
    %60 = vector.load %arg3[%c0_53, %c0_54, %c0_55, %c2_56, %c0_57] : memref<1x8x1x4x8xbf16, #tpu.memory_space<vmem>>, vector<1x8x1x1x8xbf16>
    %61 = vector.shape_cast %60 : vector<1x8x1x1x8xbf16> to vector<8x8xbf16>
    %c0_58 = arith.constant 0 : index
    %c0_59 = arith.constant 0 : index
    %c0_60 = arith.constant 0 : index
    %c2_61 = arith.constant 2 : index
    %c0_62 = arith.constant 0 : index
    %62 = vector.load %arg4[%c0_58, %c0_59, %c0_60, %c2_61, %c0_62] : memref<1x8x1x4x8xbf16, #tpu.memory_space<vmem>>, vector<1x8x1x1x8xbf16>
    %63 = vector.shape_cast %62 : vector<1x8x1x1x8xbf16> to vector<8x8xbf16>
    %cst_63 = arith.constant dense<0.000000e+00> : vector<8x8xf32>
    %64 = tpu.matmul %59, %61, %cst_63 {dimension_numbers = #tpu.dot_dimension_numbers<[1], [1], [0], [0], [0, 0, 1, 0], [], []>} : vector<8x8xbf16>, vector<8x8xbf16>, vector<8x8xf32> -> vector<8x8xf32>
    %65 = vector.broadcast %1 : vector<1x8xf32> to vector<8x8xf32>
    %66 = arith.addf %64, %65 : vector<8x8xf32>
    %cst_64 = arith.constant dense<0xFF800000> : vector<8xf32>
    %67 = vector.multi_reduction <maximumf>, %66, %cst_64 [1] : vector<8x8xf32> to vector<8xf32>
    %68 = vector.shape_cast %67 : vector<8xf32> to vector<8x1xf32>
    %69 = vector.broadcast %68 : vector<8x1xf32> to vector<8x8xf32>
    %70 = arith.subf %66, %69 : vector<8x8xf32>
    %71 = math.exp %70 : vector<8x8xf32>
    %cst_65 = arith.constant dense<0.000000e+00> : vector<8xf32>
    %72 = vector.multi_reduction <add>, %71, %cst_65 [1] : vector<8x8xf32> to vector<8xf32>
    %73 = vector.shape_cast %72 : vector<8xf32> to vector<8x1xf32>
    %74 = tpu.reciprocal %73 {approx = true} : vector<8x1xf32> -> vector<8x1xf32>
    %75 = vector.broadcast %74 : vector<8x1xf32> to vector<8x8xf32>
    %76 = arith.mulf %71, %75 : vector<8x8xf32>
    %77 = arith.truncf %76 : vector<8x8xf32> to vector<8x8xbf16>
    %cst_66 = arith.constant dense<0.000000e+00> : vector<8x8xf32>
    %78 = tpu.matmul %77, %63, %cst_66 {dimension_numbers = #tpu.dot_dimension_numbers<[1], [0], [0], [1], [0, 0, 1, 1], [], []>} : vector<8x8xbf16>, vector<8x8xbf16>, vector<8x8xf32> -> vector<8x8xf32>
    %79 = arith.truncf %78 : vector<8x8xf32> to vector<8x8xbf16>
    %c0_67 = arith.constant 0 : index
    %c0_68 = arith.constant 0 : index
    %c2_69 = arith.constant 2 : index
    %c0_70 = arith.constant 0 : index
    %80 = vector.load %arg6[%c0_67, %c0_68, %c2_69, %c0_70] : memref<1x8x4x8xbf16, #tpu.memory_space<vmem>>, vector<1x8x1x8xbf16>
    %81 = vector.shape_cast %80 : vector<1x8x1x8xbf16> to vector<8x8xbf16>
    %82 = vector.shape_cast %79 : vector<8x8xbf16> to vector<1x8x1x8xbf16>
    tpu.vector_store %arg6[%c0_67, %c0_68, %c2_69, %c0_70], %82 {strides = array<i32>} : memref<1x8x4x8xbf16, #tpu.memory_space<vmem>>, vector<1x8x1x8xbf16>,
    %c0_71 = arith.constant 0 : index
    %c0_72 = arith.constant 0 : index
    %c0_73 = arith.constant 0 : index
    %c3 = arith.constant 3 : index
    %c0_74 = arith.constant 0 : index
    %83 = vector.load %arg2[%c0_71, %c0_72, %c0_73, %c3, %c0_74] : memref<1x8x1x4x8xbf16, #tpu.memory_space<vmem>>, vector<1x8x1x1x8xbf16>
    %84 = vector.shape_cast %83 : vector<1x8x1x1x8xbf16> to vector<8x8xbf16>
    %cst_75 = arith.constant 3.535160e-01 : bf16
    %85 = vector.broadcast %cst_75 : bf16 to vector<8x8xbf16>
    %86 = arith.mulf %84, %85 : vector<8x8xbf16>
    %c0_76 = arith.constant 0 : index
    %c0_77 = arith.constant 0 : index
    %c0_78 = arith.constant 0 : index
    %c3_79 = arith.constant 3 : index
    %c0_80 = arith.constant 0 : index
    %87 = vector.load %arg3[%c0_76, %c0_77, %c0_78, %c3_79, %c0_80] : memref<1x8x1x4x8xbf16, #tpu.memory_space<vmem>>, vector<1x8x1x1x8xbf16>
    %88 = vector.shape_cast %87 : vector<1x8x1x1x8xbf16> to vector<8x8xbf16>
    %c0_81 = arith.constant 0 : index
    %c0_82 = arith.constant 0 : index
    %c0_83 = arith.constant 0 : index
    %c3_84 = arith.constant 3 : index
    %c0_85 = arith.constant 0 : index
    %89 = vector.load %arg4[%c0_81, %c0_82, %c0_83, %c3_84, %c0_85] : memref<1x8x1x4x8xbf16, #tpu.memory_space<vmem>>, vector<1x8x1x1x8xbf16>
    %90 = vector.shape_cast %89 : vector<1x8x1x1x8xbf16> to vector<8x8xbf16>
    %cst_86 = arith.constant dense<0.000000e+00> : vector<8x8xf32>
    %91 = tpu.matmul %86, %88, %cst_86 {dimension_numbers = #tpu.dot_dimension_numbers<[1], [1], [0], [0], [0, 0, 1, 0], [], []>} : vector<8x8xbf16>, vector<8x8xbf16>, vector<8x8xf32> -> vector<8x8xf32>
    %92 = vector.broadcast %1 : vector<1x8xf32> to vector<8x8xf32>
    %93 = arith.addf %91, %92 : vector<8x8xf32>
    %cst_87 = arith.constant dense<0xFF800000> : vector<8xf32>
    %94 = vector.multi_reduction <maximumf>, %93, %cst_87 [1] : vector<8x8xf32> to vector<8xf32>
    %95 = vector.shape_cast %94 : vector<8xf32> to vector<8x1xf32>
    %96 = vector.broadcast %95 : vector<8x1xf32> to vector<8x8xf32>
    %97 = arith.subf %93, %96 : vector<8x8xf32>
    %98 = math.exp %97 : vector<8x8xf32>
    %cst_88 = arith.constant dense<0.000000e+00> : vector<8xf32>
    %99 = vector.multi_reduction <add>, %98, %cst_88 [1] : vector<8x8xf32> to vector<8xf32>
    %100 = vector.shape_cast %99 : vector<8xf32> to vector<8x1xf32>
    %101 = tpu.reciprocal %100 {approx = true} : vector<8x1xf32> -> vector<8x1xf32>
    %102 = vector.broadcast %101 : vector<8x1xf32> to vector<8x8xf32>
    %103 = arith.mulf %98, %102 : vector<8x8xf32>
    %104 = arith.truncf %103 : vector<8x8xf32> to vector<8x8xbf16>
    %cst_89 = arith.constant dense<0.000000e+00> : vector<8x8xf32>
    %105 = tpu.matmul %104, %90, %cst_89 {dimension_numbers = #tpu.dot_dimension_numbers<[1], [0], [0], [1], [0, 0, 1, 1], [], []>} : vector<8x8xbf16>, vector<8x8xbf16>, vector<8x8xf32> -> vector<8x8xf32>
    %106 = arith.truncf %105 : vector<8x8xf32> to vector<8x8xbf16>
    %c0_90 = arith.constant 0 : index
    %c0_91 = arith.constant 0 : index
    %c3_92 = arith.constant 3 : index
    %c0_93 = arith.constant 0 : index
    %107 = vector.load %arg6[%c0_90, %c0_91, %c3_92, %c0_93] : memref<1x8x4x8xbf16, #tpu.memory_space<vmem>>, vector<1x8x1x8xbf16>
    %108 = vector.shape_cast %107 : vector<1x8x1x8xbf16> to vector<8x8xbf16>
    %109 = vector.shape_cast %106 : vector<8x8xbf16> to vector<1x8x1x8xbf16>
    tpu.vector_store %arg6[%c0_90, %c0_91, %c3_92, %c0_93], %109 {strides = array<i32>} : memref<1x8x4x8xbf16, #tpu.memory_space<vmem>>, vector<1x8x1x8xbf16>,
    return
  }
  func.func @transform_0(%arg0: i32, %arg1: i32) -> (i32, i32, i32, i32, i32) {
    %c0_i32 = arith.constant 0 : i32
    %c0_i32_0 = arith.constant 0 : i32
    %c0_i32_1 = arith.constant 0 : i32
    %c0_i32_2 = arith.constant 0 : i32
    return %arg0, %arg1, %c0_i32, %c0_i32_0, %c0_i32_1 : i32, i32, i32, i32, i32
  }
  func.func @transform_1(%arg0: i32, %arg1: i32) -> (i32, i32, i32, i32, i32) {
    %c0_i32 = arith.constant 0 : i32
    %c1_i32 = arith.constant 1 : i32
    %c0_i32_0 = arith.constant 0 : i32
    %c0_i32_1 = arith.constant 0 : i32
    %c0_i32_2 = arith.constant 0 : i32
    return %arg0, %c0_i32, %c1_i32, %c0_i32_0, %c0_i32_1 : i32, i32, i32, i32, i32
  }
  func.func @transform_2(%arg0: i32, %arg1: i32) -> (i32, i32, i32, i32, i32) {
    %c0_i32 = arith.constant 0 : i32
    %c2_i32 = arith.constant 2 : i32
    %c0_i32_0 = arith.constant 0 : i32
    %c0_i32_1 = arith.constant 0 : i32
    %c0_i32_2 = arith.constant 0 : i32
    return %arg0, %c0_i32, %c2_i32, %c0_i32_0, %c0_i32_1 : i32, i32, i32, i32, i32
  }
  func.func @transform_3(%arg0: i32, %arg1: i32) -> (i32, i32, i32) {
    %c0_i32 = arith.constant 0 : i32
    %c0_i32_0 = arith.constant 0 : i32
    %c0_i32_1 = arith.constant 0 : i32
    return %arg0, %c0_i32, %c0_i32_0 : i32, i32, i32
  }
  func.func @transform_4(%arg0: i32, %arg1: i32) -> (i32, i32, i32, i32) {
    %c0_i32 = arith.constant 0 : i32
    %c0_i32_0 = arith.constant 0 : i32
    %c0_i32_1 = arith.constant 0 : i32
    return %arg0, %arg1, %c0_i32, %c0_i32_0 : i32, i32, i32, i32
  }
}

module attributes {stable_mosaic.version = 11 : i64} {
  func.func @_linear_kernel(%arg0: i32, %arg1: memref<16x32xbf16, #tpu.memory_space<vmem>>, %arg2: memref<32x64xbf16, #tpu.memory_space<vmem>>, %arg3: memref<1x64xf32, #tpu.memory_space<vmem>>, %arg4: memref<16x64xbf16, #tpu.memory_space<vmem>>) attributes {dimension_semantics = [#tpu.dimension_semantics<parallel>], iteration_bounds = array<i64: 1>, scalar_prefetch = 0 : i64, scratch_operands = 0 : i64, tpu.core_type = #tpu.core_type<tc>, window_params = [{transform_indices = @transform_0, window_bounds = array<i64: 16, 32>}, {pipeline_mode = #tpu.pipeline_mode<synchronous>, transform_indices = @transform_1, window_bounds = array<i64: 32, 64>}, {pipeline_mode = #tpu.pipeline_mode<synchronous>, transform_indices = @transform_2, window_bounds = array<i64: 1, 64>}, {transform_indices = @transform_3, window_bounds = array<i64: 16, 64>}]} {
    %c0 = arith.constant 0 : index
    %c0_0 = arith.constant 0 : index
    %0 = vector.load %arg1[%c0, %c0_0] : memref<16x32xbf16, #tpu.memory_space<vmem>>, vector<16x32xbf16>
    %c0_1 = arith.constant 0 : index
    %c0_2 = arith.constant 0 : index
    %1 = vector.load %arg2[%c0_1, %c0_2] : memref<32x64xbf16, #tpu.memory_space<vmem>>, vector<32x64xbf16>
    %cst = arith.constant dense<0.000000e+00> : vector<16x64xf32>
    %2 = tpu.matmul %0, %1, %cst {dimension_numbers = #tpu.dot_dimension_numbers<[1], [0], [0], [1], [0, 0, 1, 1], [], []>} : vector<16x32xbf16>, vector<32x64xbf16>, vector<16x64xf32> -> vector<16x64xf32>
    %c0_3 = arith.constant 0 : index
    %c0_4 = arith.constant 0 : index
    %3 = vector.load %arg3[%c0_3, %c0_4] : memref<1x64xf32, #tpu.memory_space<vmem>>, vector<1x64xf32>
    %4 = vector.broadcast %3 : vector<1x64xf32> to vector<16x64xf32>
    %5 = arith.addf %2, %4 : vector<16x64xf32>
    %6 = arith.mulf %5, %5 : vector<16x64xf32>
    %7 = arith.mulf %5, %6 : vector<16x64xf32>
    %cst_5 = arith.constant 4.471500e-02 : f32
    %8 = vector.broadcast %cst_5 : f32 to vector<16x64xf32>
    %9 = arith.mulf %8, %7 : vector<16x64xf32>
    %10 = arith.addf %5, %9 : vector<16x64xf32>
    %cst_6 = arith.constant 0.797884583 : f32
    %11 = vector.broadcast %cst_6 : f32 to vector<16x64xf32>
    %12 = arith.mulf %11, %10 : vector<16x64xf32>
    %13 = math.tanh %12 : vector<16x64xf32>
    %cst_7 = arith.constant 1.000000e+00 : f32
    %14 = vector.broadcast %cst_7 : f32 to vector<16x64xf32>
    %15 = arith.addf %14, %13 : vector<16x64xf32>
    %cst_8 = arith.constant 5.000000e-01 : f32
    %16 = vector.broadcast %cst_8 : f32 to vector<16x64xf32>
    %17 = arith.mulf %16, %15 : vector<16x64xf32>
    %18 = arith.mulf %5, %17 : vector<16x64xf32>
    %19 = arith.truncf %18 : vector<16x64xf32> to vector<16x64xbf16>
    %c0_9 = arith.constant 0 : index
    %c0_10 = arith.constant 0 : index
    %20 = vector.load %arg4[%c0_9, %c0_10] : memref<16x64xbf16, #tpu.memory_space<vmem>>, vector<16x64xbf16>
    tpu.vector_store %arg4[%c0_9, %c0_10], %19 {strides = array<i32>} : memref<16x64xbf16, #tpu.memory_space<vmem>>, vector<16x64xbf16>,
    return
  }
  func.func @transform_0(%arg0: i32) -> (i32, i32) {
    %c0_i32 = arith.constant 0 : i32
    %c0_i32_0 = arith.constant 0 : i32
    return %arg0, %c0_i32 : i32, i32
  }
  func.func @transform_1(%arg0: i32) -> (i32, i32) {
    %c0_i32 = arith.constant 0 : i32
    %c0_i32_0 = arith.constant 0 : i32
    %c0_i32_1 = arith.constant 0 : i32
    return %c0_i32, %c0_i32_0 : i32, i32
  }
  func.func @transform_2(%arg0: i32) -> (i32, i32) {
    %c0_i32 = arith.constant 0 : i32
    %c0_i32_0 = arith.constant 0 : i32
    %c0_i32_1 = arith.constant 0 : i32
    return %c0_i32, %c0_i32_0 : i32, i32
  }
  func.func @transform_3(%arg0: i32) -> (i32, i32) {
    %c0_i32 = arith.constant 0 : i32
    %c0_i32_0 = arith.constant 0 : i32
    return %arg0, %c0_i32 : i32, i32
  }
}

module attributes {stable_mosaic.version = 11 : i64} {
  func.func @_linear_kernel(%arg0: i32, %arg1: memref<16x32xbf16, #tpu.memory_space<vmem>>, %arg2: memref<32x128xbf16, #tpu.memory_space<vmem>>, %arg3: memref<1x128xf32, #tpu.memory_space<vmem>>, %arg4: memref<16x128xf32, #tpu.memory_space<vmem>>) attributes {dimension_semantics = [#tpu.dimension_semantics<parallel>], iteration_bounds = array<i64: 1>, scalar_prefetch = 0 : i64, scratch_operands = 0 : i64, tpu.core_type = #tpu.core_type<tc>, window_params = [{transform_indices = @transform_0, window_bounds = array<i64: 16, 32>}, {pipeline_mode = #tpu.pipeline_mode<synchronous>, transform_indices = @transform_1, window_bounds = array<i64: 32, 128>}, {pipeline_mode = #tpu.pipeline_mode<synchronous>, transform_indices = @transform_2, window_bounds = array<i64: 1, 128>}, {transform_indices = @transform_3, window_bounds = array<i64: 16, 128>}]} {
    %c0 = arith.constant 0 : index
    %c0_0 = arith.constant 0 : index
    %0 = vector.load %arg1[%c0, %c0_0] : memref<16x32xbf16, #tpu.memory_space<vmem>>, vector<16x32xbf16>
    %c0_1 = arith.constant 0 : index
    %c0_2 = arith.constant 0 : index
    %1 = vector.load %arg2[%c0_1, %c0_2] : memref<32x128xbf16, #tpu.memory_space<vmem>>, vector<32x128xbf16>
    %cst = arith.constant dense<0.000000e+00> : vector<16x128xf32>
    %2 = tpu.matmul %0, %1, %cst {dimension_numbers = #tpu.dot_dimension_numbers<[1], [0], [0], [1], [0, 0, 1, 1], [], []>} : vector<16x32xbf16>, vector<32x128xbf16>, vector<16x128xf32> -> vector<16x128xf32>
    %c0_3 = arith.constant 0 : index
    %c0_4 = arith.constant 0 : index
    %3 = vector.load %arg3[%c0_3, %c0_4] : memref<1x128xf32, #tpu.memory_space<vmem>>, vector<1x128xf32>
    %4 = vector.broadcast %3 : vector<1x128xf32> to vector<16x128xf32>
    %5 = arith.addf %2, %4 : vector<16x128xf32>
    %c0_5 = arith.constant 0 : index
    %c0_6 = arith.constant 0 : index
    %6 = vector.load %arg4[%c0_5, %c0_6] : memref<16x128xf32, #tpu.memory_space<vmem>>, vector<16x128xf32>
    tpu.vector_store %arg4[%c0_5, %c0_6], %5 {strides = array<i32>} : memref<16x128xf32, #tpu.memory_space<vmem>>, vector<16x128xf32>,
    return
  }
  func.func @transform_0(%arg0: i32) -> (i32, i32) {
    %c0_i32 = arith.constant 0 : i32
    %c0_i32_0 = arith.constant 0 : i32
    return %arg0, %c0_i32 : i32, i32
  }
  func.func @transform_1(%arg0: i32) -> (i32, i32) {
    %c0_i32 = arith.constant 0 : i32
    %c0_i32_0 = arith.constant 0 : i32
    %c0_i32_1 = arith.constant 0 : i32
    return %c0_i32, %c0_i32_0 : i32, i32
  }
  func.func @transform_2(%arg0: i32) -> (i32, i32) {
    %c0_i32 = arith.constant 0 : i32
    %c0_i32_0 = arith.constant 0 : i32
    %c0_i32_1 = arith.constant 0 : i32
    return %c0_i32, %c0_i32_0 : i32, i32
  }
  func.func @transform_3(%arg0: i32) -> (i32, i32) {
    %c0_i32 = arith.constant 0 : i32
    %c0_i32_0 = arith.constant 0 : i32
    return %arg0, %c0_i32 : i32, i32
  }
}

module attributes {stable_mosaic.version = 11 : i64} {
  func.func @_linear_res_ln_kernel(%arg0: i32, %arg1: memref<16x64xbf16, #tpu.memory_space<vmem>>, %arg2: memref<64x32xbf16, #tpu.memory_space<vmem>>, %arg3: memref<1x32xf32, #tpu.memory_space<vmem>>, %arg4: memref<16x32xbf16, #tpu.memory_space<vmem>>, %arg5: memref<1x32xf32, #tpu.memory_space<vmem>>, %arg6: memref<1x32xf32, #tpu.memory_space<vmem>>, %arg7: memref<16x32xbf16, #tpu.memory_space<vmem>>) attributes {dimension_semantics = [#tpu.dimension_semantics<parallel>], iteration_bounds = array<i64: 1>, scalar_prefetch = 0 : i64, scratch_operands = 0 : i64, tpu.core_type = #tpu.core_type<tc>, window_params = [{transform_indices = @transform_0, window_bounds = array<i64: 16, 64>}, {pipeline_mode = #tpu.pipeline_mode<synchronous>, transform_indices = @transform_1, window_bounds = array<i64: 64, 32>}, {pipeline_mode = #tpu.pipeline_mode<synchronous>, transform_indices = @transform_2, window_bounds = array<i64: 1, 32>}, {transform_indices = @transform_3, window_bounds = array<i64: 16, 32>}, {pipeline_mode = #tpu.pipeline_mode<synchronous>, transform_indices = @transform_4, window_bounds = array<i64: 1, 32>}, {pipeline_mode = #tpu.pipeline_mode<synchronous>, transform_indices = @transform_5, window_bounds = array<i64: 1, 32>}, {transform_indices = @transform_6, window_bounds = array<i64: 16, 32>}]} {
    %c0 = arith.constant 0 : index
    %c0_0 = arith.constant 0 : index
    %0 = vector.load %arg1[%c0, %c0_0] : memref<16x64xbf16, #tpu.memory_space<vmem>>, vector<16x64xbf16>
    %c0_1 = arith.constant 0 : index
    %c0_2 = arith.constant 0 : index
    %1 = vector.load %arg2[%c0_1, %c0_2] : memref<64x32xbf16, #tpu.memory_space<vmem>>, vector<64x32xbf16>
    %cst = arith.constant dense<0.000000e+00> : vector<16x32xf32>
    %2 = tpu.matmul %0, %1, %cst {dimension_numbers = #tpu.dot_dimension_numbers<[1], [0], [0], [1], [0, 0, 1, 1], [], []>} : vector<16x64xbf16>, vector<64x32xbf16>, vector<16x32xf32> -> vector<16x32xf32>
    %c0_3 = arith.constant 0 : index
    %c0_4 = arith.constant 0 : index
    %3 = vector.load %arg3[%c0_3, %c0_4] : memref<1x32xf32, #tpu.memory_space<vmem>>, vector<1x32xf32>
    %4 = vector.broadcast %3 : vector<1x32xf32> to vector<16x32xf32>
    %5 = arith.addf %2, %4 : vector<16x32xf32>
    %c0_5 = arith.constant 0 : index
    %c0_6 = arith.constant 0 : index
    %6 = vector.load %arg4[%c0_5, %c0_6] : memref<16x32xbf16, #tpu.memory_space<vmem>>, vector<16x32xbf16>
    %7 = arith.extf %6 : vector<16x32xbf16> to vector<16x32xf32>
    %8 = arith.addf %5, %7 : vector<16x32xf32>
    %cst_7 = arith.constant dense<0.000000e+00> : vector<16xf32>
    %9 = vector.multi_reduction <add>, %8, %cst_7 [1] : vector<16x32xf32> to vector<16xf32>
    %10 = vector.shape_cast %9 : vector<16xf32> to vector<16x1xf32>
    %cst_8 = arith.constant 3.200000e+01 : f32
    %11 = vector.broadcast %cst_8 : f32 to vector<16x1xf32>
    %12 = arith.divf %10, %11 : vector<16x1xf32>
    %13 = vector.broadcast %12 : vector<16x1xf32> to vector<16x32xf32>
    %14 = arith.subf %8, %13 : vector<16x32xf32>
    %15 = arith.mulf %14, %14 : vector<16x32xf32>
    %cst_9 = arith.constant dense<0.000000e+00> : vector<16xf32>
    %16 = vector.multi_reduction <add>, %15, %cst_9 [1] : vector<16x32xf32> to vector<16xf32>
    %17 = vector.shape_cast %16 : vector<16xf32> to vector<16x1xf32>
    %cst_10 = arith.constant 3.200000e+01 : f32
    %18 = vector.broadcast %cst_10 : f32 to vector<16x1xf32>
    %19 = arith.divf %17, %18 : vector<16x1xf32>
    %20 = vector.broadcast %12 : vector<16x1xf32> to vector<16x32xf32>
    %21 = arith.subf %8, %20 : vector<16x32xf32>
    %cst_11 = arith.constant 9.99999996E-13 : f32
    %22 = vector.broadcast %cst_11 : f32 to vector<16x1xf32>
    %23 = arith.addf %19, %22 : vector<16x1xf32>
    %24 = math.rsqrt %23 : vector<16x1xf32>
    %25 = vector.broadcast %24 : vector<16x1xf32> to vector<16x32xf32>
    %26 = arith.mulf %21, %25 : vector<16x32xf32>
    %c0_12 = arith.constant 0 : index
    %c0_13 = arith.constant 0 : index
    %27 = vector.load %arg5[%c0_12, %c0_13] : memref<1x32xf32, #tpu.memory_space<vmem>>, vector<1x32xf32>
    %28 = vector.broadcast %27 : vector<1x32xf32> to vector<16x32xf32>
    %29 = arith.mulf %26, %28 : vector<16x32xf32>
    %c0_14 = arith.constant 0 : index
    %c0_15 = arith.constant 0 : index
    %30 = vector.load %arg6[%c0_14, %c0_15] : memref<1x32xf32, #tpu.memory_space<vmem>>, vector<1x32xf32>
    %31 = vector.broadcast %30 : vector<1x32xf32> to vector<16x32xf32>
    %32 = arith.addf %29, %31 : vector<16x32xf32>
    %33 = arith.truncf %32 : vector<16x32xf32> to vector<16x32xbf16>
    %c0_16 = arith.constant 0 : index
    %c0_17 = arith.constant 0 : index
    %34 = vector.load %arg7[%c0_16, %c0_17] : memref<16x32xbf16, #tpu.memory_space<vmem>>, vector<16x32xbf16>
    tpu.vector_store %arg7[%c0_16, %c0_17], %33 {strides = array<i32>} : memref<16x32xbf16, #tpu.memory_space<vmem>>, vector<16x32xbf16>,
    return
  }
  func.func @transform_0(%arg0: i32) -> (i32, i32) {
    %c0_i32 = arith.constant 0 : i32
    %c0_i32_0 = arith.constant 0 : i32
    return %arg0, %c0_i32 : i32, i32
  }
  func.func @transform_1(%arg0: i32) -> (i32, i32) {
    %c0_i32 = arith.constant 0 : i32
    %c0_i32_0 = arith.constant 0 : i32
    %c0_i32_1 = arith.constant 0 : i32
    return %c0_i32, %c0_i32_0 : i32, i32
  }
  func.func @transform_2(%arg0: i32) -> (i32, i32) {
    %c0_i32 = arith.constant 0 : i32
    %c0_i32_0 = arith.constant 0 : i32
    %c0_i32_1 = arith.constant 0 : i32
    return %c0_i32, %c0_i32_0 : i32, i32
  }
  func.func @transform_3(%arg0: i32) -> (i32, i32) {
    %c0_i32 = arith.constant 0 : i32
    %c0_i32_0 = arith.constant 0 : i32
    return %arg0, %c0_i32 : i32, i32
  }
  func.func @transform_4(%arg0: i32) -> (i32, i32) {
    %c0_i32 = arith.constant 0 : i32
    %c0_i32_0 = arith.constant 0 : i32
    %c0_i32_1 = arith.constant 0 : i32
    return %c0_i32, %c0_i32_0 : i32, i32
  }
  func.func @transform_5(%arg0: i32) -> (i32, i32) {
    %c0_i32 = arith.constant 0 : i32
    %c0_i32_0 = arith.constant 0 : i32
    %c0_i32_1 = arith.constant 0 : i32
    return %c0_i32, %c0_i32_0 : i32, i32
  }
  func.func @transform_6(%arg0: i32) -> (i32, i32) {
    %c0_i32 = arith.constant 0 : i32
    %c0_i32_0 = arith.constant 0 : i32
    return %arg0, %c0_i32 : i32, i32
  }
}

</mosaic_0001>

<bundles_post_ra>
// kernel: fwd_with_labels.12
= control target key start
LH: loop header
LB: loop body
LE: loop exit
PB: predicated region body
PF: predicated region fallthrough
CT: control target
= control target key end

     0   :  { %vm16_vm0 = vcmask 261120   ;;  %vm70_vm1 = vcmask 257024   ;;  %s129_s0 = inlined_call_operand.vmem [shape: f32[16,32], index: 0, kind: input, shape index: {}]   ;;  %s130_s1 = inlined_call_operand.vmem [shape: f32[1,32], index: 1, kind: input, shape index: {}]   ;;  %s131_s2 = inlined_call_operand.vmem [shape: f32[1,32], index: 2, kind: input, shape index: {}]   ;;  %s132_s3 = inlined_call_operand.vmem [shape: bf16[16,32], index: 3, kind: output, shape index: {}]  }
   0x1   :  { %v14_v0 = vld [vmem:[%s129_s0] sm:$0xff]  ;;  %v15_v1 = vld [vmem:[%s129_s0 + $0x8] sm:$0xff] }
   0x2   :  { %v17_v2 = vsel %vm16_vm0, %v14_v0, 0.0  ;;  %v20_v3 = vsel %vm16_vm0, %v15_v1, 0.0  ;;  %v77_v21 = vld [vmem:[%s130_s1] ss:$0 sm:$0xff] }
   0x3   :  { %18 = vadd.xlane.f32.xlu0 %v17_v2  ;;  %v78_v23 = vld [vmem:[%s131_s2] ss:$0 sm:$0xff] }
   0x7   :  { %21 = vadd.xlane.f32.xlu0 %v20_v3 }
  0x8c   :  { %v19_v4 = vpop.xlane.xlu0 %18 }
  0x8d   :  { %v24_v5 = vmul.f32 0.03125, %v19_v4 }
  0x8f   :  { %v26_v6 = vsub.f32 %v14_v0, %v24_v5 }
  0x90   :  { %v22_v7 = vpop.xlane.xlu0 %21 }
  0x91   :  { %v25_v8 = vmul.f32 0.03125, %v22_v7  ;;  %v28_v9 = vmul.f32 %v26_v6, %v26_v6 }
  0x93   :  { %v27_v10 = vsub.f32 %v15_v1, %v25_v8  ;;  %v30_v11 = vsel %vm16_vm0, %v28_v9, 0.0 }
  0x94   :  { %31 = vadd.xlane.f32.xlu1 %v30_v11 }
  0x95   :  { %v29_v12 = vmul.f32 %v27_v10, %v27_v10 }
  0x97   :  { %v33_v13 = vsel %vm16_vm0, %v29_v12, 0.0 }
  0x98   :  { %34 = vadd.xlane.f32.xlu1 %v33_v13 }
 0x11d   :  { %v32_v14 = vpop.xlane.xlu1 %31 }
 0x11e   :  { %v36_v15 = vmul.f32 0.03125, %v32_v14 }
 0x120   :  { %v38_v16 = vadd.f32 1e-12, %v36_v15 }
 0x121   :  { %v35_v17 = vpop.xlane.xlu1 %34 }
 0x122   :  { %83 = vrsqrt.f32 %v38_v16  ;;  %v37_v18 = vmul.f32 0.03125, %v35_v17 }
 0x124   :  { %v39_v19 = vadd.f32 1e-12, %v37_v18 }
 0x126   :  { %85 = vrsqrt.f32 %v39_v19 }
 0x12f   :  { %v84_v20 = vpop.eup %83 }
 0x130   :  { %v42_v22 = vmul.f32 %v84_v20, %v26_v6 }
 0x132   :  { %v51_v24 = vmul.f32 %v77_v21, %v42_v22 }
 0x133   :  { %v86_v25 = vpop.eup %85 }
 0x134   :  { %v60_v26 = vadd.f32 %v78_v23, %v51_v24  ;;  %v43_v27 = vmul.f32 %v86_v25, %v27_v10 }
 0x136   :  { %v81_v28 = vpack.c.bf16 %v60_v26, %v60_v26  ;;  %v52_v29 = vmul.f32 %v77_v21, %v43_v27 }
 0x138   :  { %71 = vst.msk [vmem:[%s132_s3] sm:$0xf] %vm70_vm1, %v81_v28  ;;  %v61_v30 = vadd.f32 %v78_v23, %v52_v29 }
 0x13a   :  { %v82_v31 = vpack.c.bf16 %v61_v30, %v61_v30 }
 0x13c   :  { %72 = vst.msk [vmem:[%s132_s3 + $0x4] sm:$0xf] %vm70_vm1, %v82_v31 }

// kernel: fwd_with_labels.13
= control target key start
LH: loop header
LB: loop body
LE: loop exit
PB: predicated region body
PF: predicated region fallthrough
CT: control target
= control target key end

     0   :  { %v130_v0 = vmov 0.0   ;;  %vm131_vm0 = vmmov 0   ;;  %vm45_vm1 = vcmask 261120   ;;  %vm98_vm2 = vcmask 781312   ;;  %s170_s1 = inlined_call_operand.vmem [shape: bf16[32,96], index: 1, kind: input, shape index: {}]   ;;  %s171_s0 = inlined_call_operand.vmem [shape: bf16[16,32], index: 0, kind: input, shape index: {}]   ;;  %s172_s2 = inlined_call_operand.vmem [shape: f32[1,96], index: 2, kind: input, shape index: {}]   ;;  %s173_s3 = inlined_call_operand.vmem [shape: bf16[16,96], index: 3, kind: output, shape index: {}]  }
   0x1   :  { %117 = vmatprep.subr.bf16.mxu0 %v130_v0  ;;  %v127_v1 = vld [vmem:[%s170_s1 + $0x8] sm:$0xff]   ;;  %121 = vmatprep.mubr.msk.bf16.mxu0 %vm131_vm0, %v130_v0  ;;  %v128_v2 = vld [vmem:[%s170_s1] sm:$0xff]  }
   0x2   :  { %118 = vmatpush3.bf16.msra.mxu0 %v127_v1  ;;  %v129_v3 = vld [vmem:[%s171_s0] sm:$0xff]  }
   0x3   :  { %119 = vmatprep.subr.bf16.mxu0 %v130_v0  ;;  %v105_v4 = vld [vmem:[%s172_s2] ss:$0 sm:$0xff] }
   0x6   :  { %120 = vmatpush3.bf16.msra.mxu0 %v128_v2 }
   0x9   :  { %122 = vmatmul.mubr.msk.bf16.vlgmr.msra.gmra.mxu0 %vm45_vm1, %v129_v3 }
  0xc9   :  { %v83_v5 = vpop.f32.mrf.mxu0 }
  0xca   :  { %v84_v6 = vadd.f32 %v105_v4, %v83_v5 }
  0xcb   :  { %v123_v7 = vpop.f32.mrf.mxu0 }
  0xcc   :  { %v112_v8 = vpack.c.bf16 %v84_v6, %v84_v6 }
  0xcd   :  { %v86_v9 = vpop.f32.mrf.mxu0 }
  0xce   :  { %99 = vst.msk [vmem:[%s173_s3] sm:$0xf] %vm98_vm2, %v112_v8  ;;  %v87_v10 = vadd.f32 %v105_v4, %v86_v9 }
  0xcf   :  { %v124_v11 = vpop.f32.mrf.mxu0 }
  0xd0   :  { %v113_v12 = vpack.c.bf16 %v87_v10, %v87_v10 }
  0xd2   :  { %100 = vst.msk [vmem:[%s173_s3 + $0x4] sm:$0xf] %vm98_vm2, %v113_v12 }

// kernel: fwd_with_labels.15
= control target key start
LH: loop header
LB: loop body
LE: loop exit
PB: predicated region body
PF: predicated region fallthrough
CT: control target
= control target key end

     0   :  { %v200_v0 = vmov 0.0   ;;  %vm201_vm0 = vmmov 0   ;;  %vm54_vm1 = vcmask 261120   ;;  %vm158_vm2 = vcmask 257024   ;;  %s269_s1 = inlined_call_operand.vmem [shape: bf16[32,32], index: 1, kind: input, shape index: {}]   ;;  %s270_s0 = inlined_call_operand.vmem [shape: bf16[16,32], index: 0, kind: input, shape index: {}]   ;;  %s271_s3 = inlined_call_operand.vmem [shape: bf16[16,32], index: 3, kind: input, shape index: {}]   ;;  %s272_s2 = inlined_call_operand.vmem [shape: f32[1,32], index: 2, kind: input, shape index: {}]   ;;  %s273_s4 = inlined_call_operand.vmem [shape: f32[1,32], index: 4, kind: input, shape index: {}]   ;;  %s274_s5 = inlined_call_operand.vmem [shape: f32[1,32], index: 5, kind: input, shape index: {}]   ;;  %s275_s6 = inlined_call_operand.vmem [shape: bf16[16,32], index: 6, kind: output, shape index: {}]  }
   0x1   :  { %183 = vmatprep.subr.bf16.mxu0 %v200_v0  ;;  %v193_v1 = vld [vmem:[%s269_s1 + $0x8] sm:$0xff]   ;;  %187 = vmatprep.mubr.msk.bf16.mxu0 %vm201_vm0, %v200_v0  ;;  %v194_v2 = vld [vmem:[%s269_s1] sm:$0xff]  }
   0x2   :  { %184 = vmatpush3.bf16.msra.mxu0 %v193_v1  ;;  %v195_v3 = vld [vmem:[%s270_s0] sm:$0xff]  }
   0x3   :  { %185 = vmatprep.subr.bf16.mxu0 %v200_v0  ;;  %v177_v4 = vld [vmem:[%s271_s3] sm:$0xff]  }
   0x4   :  { %v165_v5 = vld [vmem:[%s272_s2] ss:$0 sm:$0xff]  ;;  %v178_v6 = vunpack.c.l.bf16 %v177_v4  ;;  %v179_v11 = vunpack.c.h.bf16 %v177_v4 }
   0x5   :  { %v170_v35 = vld [vmem:[%s273_s4] ss:$0 sm:$0xff] }
   0x6   :  { %186 = vmatpush3.bf16.msra.mxu0 %v194_v2  ;;  %v171_v37 = vld [vmem:[%s274_s5] ss:$0 sm:$0xff] }
   0x9   :  { %188 = vmatmul.mubr.msk.bf16.vlgmr.msra.gmra.mxu0 %vm54_vm1, %v195_v3 }
  0xc9   :  { %v92_v7 = vpop.f32.mrf.mxu0 }
  0xca   :  { %v93_v8 = vadd.f32 %v165_v5, %v92_v7 }
  0xcb   :  { %v189_v9 = vpop.f32.mrf.mxu0 }
  0xcc   :  { %v103_v10 = vadd.f32 %v178_v6, %v93_v8 }
  0xcd   :  { %v95_v12 = vpop.f32.mrf.mxu0 }
  0xce   :  { %v96_v13 = vadd.f32 %v165_v5, %v95_v12  ;;  %v105_v14 = vsel %vm54_vm1, %v103_v10, 0.0 }
  0xcf   :  { %106 = vadd.xlane.f32.xlu0 %v105_v14  ;;  %v190_v15 = vpop.f32.mrf.mxu0 }
  0xd0   :  { %v104_v16 = vadd.f32 %v179_v11, %v96_v13 }
  0xd2   :  { %v108_v17 = vsel %vm54_vm1, %v104_v16, 0.0 }
  0xd3   :  { %109 = vadd.xlane.f32.xlu0 %v108_v17 }
 0x158   :  { %v107_v18 = vpop.xlane.xlu0 %106 }
 0x159   :  { %v112_v19 = vmul.f32 0.03125, %v107_v18 }
 0x15b   :  { %v114_v20 = vsub.f32 %v103_v10, %v112_v19 }
 0x15c   :  { %v110_v21 = vpop.xlane.xlu0 %109 }
 0x15d   :  { %v113_v22 = vmul.f32 0.03125, %v110_v21  ;;  %v116_v23 = vmul.f32 %v114_v20, %v114_v20 }
 0x15f   :  { %v115_v24 = vsub.f32 %v104_v16, %v113_v22  ;;  %v118_v25 = vsel %vm54_vm1, %v116_v23, 0.0 }
 0x160   :  { %119 = vadd.xlane.f32.xlu1 %v118_v25 }
 0x161   :  { %v117_v26 = vmul.f32 %v115_v24, %v115_v24 }
 0x163   :  { %v121_v27 = vsel %vm54_vm1, %v117_v26, 0.0 }
 0x164   :  { %122 = vadd.xlane.f32.xlu1 %v121_v27 }
 0x1e9   :  { %v120_v28 = vpop.xlane.xlu1 %119 }
 0x1ea   :  { %v124_v29 = vmul.f32 0.03125, %v120_v28 }
 0x1ec   :  { %v126_v30 = vadd.f32 1e-12, %v124_v29 }
 0x1ed   :  { %v123_v31 = vpop.xlane.xlu1 %122 }
 0x1ee   :  { %196 = vrsqrt.f32 %v126_v30  ;;  %v125_v32 = vmul.f32 0.03125, %v123_v31 }
 0x1f0   :  { %v127_v33 = vadd.f32 1e-12, %v125_v32 }
 0x1f2   :  { %198 = vrsqrt.f32 %v127_v33 }
 0x1fb   :  { %v197_v34 = vpop.eup %196 }
 0x1fc   :  { %v130_v36 = vmul.f32 %v197_v34, %v114_v20 }
 0x1fe   :  { %v139_v38 = vmul.f32 %v170_v35, %v130_v36 }
 0x1ff   :  { %v199_v39 = vpop.eup %198 }
 0x200   :  { %v148_v40 = vadd.f32 %v171_v37, %v139_v38  ;;  %v131_v41 = vmul.f32 %v199_v39, %v115_v24 }
 0x202   :  { %v174_v42 = vpack.c.bf16 %v148_v40, %v148_v40  ;;  %v140_v43 = vmul.f32 %v170_v35, %v131_v41 }
 0x204   :  { %159 = vst.msk [vmem:[%s275_s6] sm:$0xf] %vm158_vm2, %v174_v42  ;;  %v149_v44 = vadd.f32 %v171_v37, %v140_v43 }
 0x206   :  { %v175_v45 = vpack.c.bf16 %v149_v44, %v149_v44 }
 0x208   :  { %160 = vst.msk [vmem:[%s275_s6 + $0x4] sm:$0xf] %vm158_vm2, %v175_v45 }

// kernel: fwd_with_labels.16
= control target key start
LH: loop header
LB: loop body
LE: loop exit
PB: predicated region body
PF: predicated region fallthrough
CT: control target
= control target key end

     0   :  { %v152_v0 = vmov 0.0   ;;  %vm153_vm0 = vmmov 0   ;;  %vm45_vm1 = vcmask 261120   ;;  %vm116_vm2 = vcmask 519168   ;;  %s192_s1 = inlined_call_operand.vmem [shape: bf16[32,64], index: 1, kind: input, shape index: {}]   ;;  %s193_s0 = inlined_call_operand.vmem [shape: bf16[16,32], index: 0, kind: input, shape index: {}]   ;;  %s194_s2 = inlined_call_operand.vmem [shape: f32[1,64], index: 2, kind: input, shape index: {}]   ;;  %s195_s3 = inlined_call_operand.vmem [shape: bf16[16,64], index: 3, kind: output, shape index: {}]  }
   0x1   :  { %135 = vmatprep.subr.bf16.mxu0 %v152_v0  ;;  %v145_v1 = vld [vmem:[%s192_s1 + $0x8] sm:$0xff]   ;;  %139 = vmatprep.mubr.msk.bf16.mxu0 %vm153_vm0, %v152_v0  ;;  %v146_v2 = vld [vmem:[%s192_s1] sm:$0xff]  }
   0x2   :  { %136 = vmatpush3.bf16.msra.mxu0 %v145_v1  ;;  %v147_v3 = vld [vmem:[%s193_s0] sm:$0xff]  }
   0x3   :  { %137 = vmatprep.subr.bf16.mxu0 %v152_v0  ;;  %v123_v4 = vld [vmem:[%s194_s2] ss:$0 sm:$0xff] }
   0x6   :  { %138 = vmatpush3.bf16.msra.mxu0 %v146_v2 }
   0x9   :  { %140 = vmatmul.mubr.msk.bf16.vlgmr.msra.gmra.mxu0 %vm45_vm1, %v147_v3 }
  0xc9   :  { %v83_v5 = vpop.f32.mrf.mxu0 }
  0xca   :  { %v84_v6 = vadd.f32 %v123_v4, %v83_v5 }
  0xcb   :  { %v141_v7 = vpop.f32.mrf.mxu0 }
  0xcc   :  { %v90_v8 = vmul.f32 %v84_v6, %v84_v6 }
  0xcd   :  { %v86_v9 = vpop.f32.mrf.mxu0 }
  0xce   :  { %v92_v10 = vmul.f32 %v90_v8, %v84_v6  ;;  %v87_v11 = vadd.f32 %v123_v4, %v86_v9 }
  0xcf   :  { %v142_v12 = vpop.f32.mrf.mxu0 }
  0xd0   :  { %v94_v13 = vmul.f32 0.044715, %v92_v10  ;;  %v91_v14 = vmul.f32 %v87_v11, %v87_v11 }
  0xd2   :  { %v96_v15 = vadd.f32 %v94_v13, %v84_v6  ;;  %v93_v16 = vmul.f32 %v91_v14, %v87_v11 }
  0xd4   :  { %v98_v17 = vmul.f32 0.7978846, %v96_v15  ;;  %v95_v18 = vmul.f32 0.044715, %v93_v16 }
  0xd6   :  { %148 = vtanh.f32 %v98_v17  ;;  %v97_v19 = vadd.f32 %v95_v18, %v87_v11 }
  0xd8   :  { %v99_v20 = vmul.f32 0.7978846, %v97_v19 }
  0xda   :  { %150 = vtanh.f32 %v99_v20 }
  0xe3   :  { %v149_v21 = vpop.eup %148 }
  0xe4   :  { %v102_v22 = vadd.f32 1.0, %v149_v21 }
  0xe6   :  { %v104_v23 = vmul.f32 0.5, %v102_v22 }
  0xe7   :  { %v151_v24 = vpop.eup %150 }
  0xe8   :  { %v106_v25 = vmul.f32 %v104_v23, %v84_v6  ;;  %v103_v26 = vadd.f32 1.0, %v151_v24 }
  0xea   :  { %v130_v27 = vpack.c.bf16 %v106_v25, %v106_v25  ;;  %v105_v28 = vmul.f32 0.5, %v103_v26 }
  0xec   :  { %117 = vst.msk [vmem:[%s195_s3] sm:$0xf] %vm116_vm2, %v130_v27  ;;  %v107_v29 = vmul.f32 %v105_v28, %v87_v11 }
  0xee   :  { %v131_v30 = vpack.c.bf16 %v107_v29, %v107_v29 }
  0xf0   :  { %118 = vst.msk [vmem:[%s195_s3 + $0x4] sm:$0xf] %vm116_vm2, %v131_v30 }

// kernel: fwd_with_labels.23
= control target key start
LH: loop header
LB: loop body
LE: loop exit
PB: predicated region body
PF: predicated region fallthrough
CT: control target
= control target key end

     0   :  { %v117_v0 = vmov 0.0   ;;  %vm118_vm0 = vmmov 0   ;;  %vm45_vm1 = vcmask 261120   ;;  %s157_s1 = inlined_call_operand.vmem [shape: bf16[32,128], index: 1, kind: input, shape index: {}]   ;;  %s158_s0 = inlined_call_operand.vmem [shape: bf16[16,32], index: 0, kind: input, shape index: {}]   ;;  %s159_s2 = inlined_call_operand.vmem [shape: f32[1,128], index: 2, kind: input, shape index: {}]   ;;  %s160_s3 = inlined_call_operand.vmem [shape: f32[16,128], index: 3, kind: output, shape index: {}]  }
   0x1   :  { %104 = vmatprep.subr.bf16.mxu0 %v117_v0  ;;  %v114_v1 = vld [vmem:[%s157_s1 + $0x8] sm:$0xff]   ;;  %108 = vmatprep.mubr.msk.bf16.mxu0 %vm118_vm0, %v117_v0  ;;  %v115_v2 = vld [vmem:[%s157_s1] sm:$0xff]  }
   0x2   :  { %105 = vmatpush3.bf16.msra.mxu0 %v114_v1  ;;  %v116_v3 = vld [vmem:[%s158_s0] sm:$0xff]  }
   0x3   :  { %106 = vmatprep.subr.bf16.mxu0 %v117_v0  ;;  %v96_v4 = vld [vmem:[%s159_s2] ss:$0 sm:$0xff] }
   0x6   :  { %107 = vmatpush3.bf16.msra.mxu0 %v115_v2 }
   0x9   :  { %109 = vmatmul.mubr.msk.bf16.vlgmr.msra.gmra.mxu0 %vm45_vm1, %v116_v3 }
  0xc9   :  { %v83_v5 = vpop.f32.mrf.mxu0 }
  0xca   :  { %v84_v6 = vadd.f32 %v96_v4, %v83_v5 }
  0xcb   :  { %v110_v7 = vpop.f32.mrf.mxu0 }
  0xcc   :  { %90 = vst [vmem:[%s160_s3] sm:$0xff] %v84_v6 }
  0xcd   :  { %v86_v8 = vpop.f32.mrf.mxu0 }
  0xce   :  { %v87_v9 = vadd.f32 %v96_v4, %v86_v8 }
  0xcf   :  { %v111_v10 = vpop.f32.mrf.mxu0 }
  0xd0   :  { %91 = vst [vmem:[%s160_s3 + $0x8] sm:$0xff] %v87_v9 }

// kernel: fwd_with_labels.17
= control target key start
LH: loop header
LB: loop body
LE: loop exit
PB: predicated region body
PF: predicated region fallthrough
CT: control target
= control target key end

     0   :  { %v227_v0 = vmov 0.0   ;;  %vm228_vm0 = vmmov 0   ;;  %vm70_vm1 = vcmask 523264   ;;  %vm121_vm2 = vcmask 261120   ;;  %s301_s1 = inlined_call_operand.vmem [shape: bf16[64,32], index: 1, kind: input, shape index: {}]   ;;  %s302_s0 = inlined_call_operand.vmem [shape: bf16[16,64], index: 0, kind: input, shape index: {}]   ;;  %s303_s3 = inlined_call_operand.vmem [shape: bf16[16,32], index: 3, kind: input, shape index: {}]   ;;  %s304_s2 = inlined_call_operand.vmem [shape: f32[1,32], index: 2, kind: input, shape index: {}]   ;;  %s305_s4 = inlined_call_operand.vmem [shape: f32[1,32], index: 4, kind: input, shape index: {}]   ;;  %s306_s5 = inlined_call_operand.vmem [shape: f32[1,32], index: 5, kind: input, shape index: {}]   ;;  %s307_s6 = inlined_call_operand.vmem [shape: bf16[16,32], index: 6, kind: output, shape index: {}]  }
   0x1   :  { %204 = vmatprep.subr.bf16.mxu0 %v227_v0  ;;  %v218_v1 = vld [vmem:[%s301_s1 + $0x18] sm:$0xff]   ;;  %212 = vmatprep.mubr.msk.bf16.mxu0 %vm228_vm0, %v227_v0  ;;  %v219_v2 = vld [vmem:[%s301_s1 + $0x10] sm:$0xff]   ;;  %v220_v3 = vld [vmem:[%s301_s1 + $0x8] sm:$0xff]   ;;  %vm175_vm3 = vcmask 257024  }
   0x2   :  { %205 = vmatpush3.bf16.msra.mxu0 %v218_v1  ;;  %v221_v4 = vld [vmem:[%s301_s1] sm:$0xff]  }
   0x3   :  { %206 = vmatprep.subr.bf16.mxu0 %v227_v0  ;;  %v222_v5 = vld [vmem:[%s302_s0] sm:$0xff]  }
   0x4   :  { %v196_v6 = vld [vmem:[%s303_s3] sm:$0xff]  }
   0x5   :  { %v182_v7 = vld [vmem:[%s304_s2] ss:$0 sm:$0xff]  ;;  %v197_v8 = vunpack.c.l.bf16 %v196_v6  ;;  %v198_v13 = vunpack.c.h.bf16 %v196_v6 }
   0x6   :  { %207 = vmatpush3.bf16.msra.mxu0 %v219_v2  ;;  %v189_v37 = vld [vmem:[%s305_s4] ss:$0 sm:$0xff] }
   0x7   :  { %208 = vmatprep.subr.bf16.mxu0 %v227_v0  ;;  %v190_v39 = vld [vmem:[%s306_s5] ss:$0 sm:$0xff] }
   0xa   :  { %209 = vmatpush3.bf16.msra.mxu0 %v220_v3 }
   0xb   :  { %210 = vmatprep.subr.bf16.mxu0 %v227_v0 }
   0xe   :  { %211 = vmatpush3.bf16.msra.mxu0 %v221_v4 }
  0x11   :  { %213 = vmatmul.mubr.msk.bf16.vlgmr.msra.gmra.mxu0 %vm70_vm1, %v222_v5 }
  0xd1   :  { %v108_v9 = vpop.f32.mrf.mxu0 }
  0xd2   :  { %v109_v10 = vadd.f32 %v182_v7, %v108_v9 }
  0xd3   :  { %v214_v11 = vpop.f32.mrf.mxu0 }
  0xd4   :  { %v119_v12 = vadd.f32 %v197_v8, %v109_v10 }
  0xd5   :  { %v111_v14 = vpop.f32.mrf.mxu0 }
  0xd6   :  { %v112_v15 = vadd.f32 %v182_v7, %v111_v14  ;;  %v122_v16 = vsel %vm121_vm2, %v119_v12, 0.0 }
  0xd7   :  { %123 = vadd.xlane.f32.xlu0 %v122_v16  ;;  %v215_v17 = vpop.f32.mrf.mxu0 }
  0xd8   :  { %v120_v18 = vadd.f32 %v198_v13, %v112_v15 }
  0xda   :  { %v125_v19 = vsel %vm121_vm2, %v120_v18, 0.0 }
  0xdb   :  { %126 = vadd.xlane.f32.xlu0 %v125_v19 }
 0x160   :  { %v124_v20 = vpop.xlane.xlu0 %123 }
 0x161   :  { %v129_v21 = vmul.f32 0.03125, %v124_v20 }
 0x163   :  { %v131_v22 = vsub.f32 %v119_v12, %v129_v21 }
 0x164   :  { %v127_v23 = vpop.xlane.xlu0 %126 }
 0x165   :  { %v130_v24 = vmul.f32 0.03125, %v127_v23  ;;  %v133_v25 = vmul.f32 %v131_v22, %v131_v22 }
 0x167   :  { %v132_v26 = vsub.f32 %v120_v18, %v130_v24  ;;  %v135_v27 = vsel %vm121_vm2, %v133_v25, 0.0 }
 0x168   :  { %136 = vadd.xlane.f32.xlu1 %v135_v27 }
 0x169   :  { %v134_v28 = vmul.f32 %v132_v26, %v132_v26 }
 0x16b   :  { %v138_v29 = vsel %vm121_vm2, %v134_v28, 0.0 }
 0x16c   :  { %139 = vadd.xlane.f32.xlu1 %v138_v29 }
 0x1f1   :  { %v137_v30 = vpop.xlane.xlu1 %136 }
 0x1f2   :  { %v141_v31 = vmul.f32 0.03125, %v137_v30 }
 0x1f4   :  { %v143_v32 = vadd.f32 1e-12, %v141_v31 }
 0x1f5   :  { %v140_v33 = vpop.xlane.xlu1 %139 }
 0x1f6   :  { %223 = vrsqrt.f32 %v143_v32  ;;  %v142_v34 = vmul.f32 0.03125, %v140_v33 }
 0x1f8   :  { %v144_v35 = vadd.f32 1e-12, %v142_v34 }
 0x1fa   :  { %225 = vrsqrt.f32 %v144_v35 }
 0x203   :  { %v224_v36 = vpop.eup %223 }
 0x204   :  { %v147_v38 = vmul.f32 %v224_v36, %v131_v22 }
 0x206   :  { %v156_v40 = vmul.f32 %v189_v37, %v147_v38 }
 0x207   :  { %v226_v41 = vpop.eup %225 }
 0x208   :  { %v165_v42 = vadd.f32 %v190_v39, %v156_v40  ;;  %v148_v43 = vmul.f32 %v226_v41, %v132_v26 }
 0x20a   :  { %v193_v44 = vpack.c.bf16 %v165_v42, %v165_v42  ;;  %v157_v45 = vmul.f32 %v189_v37, %v148_v43 }
 0x20c   :  { %176 = vst.msk [vmem:[%s307_s6] sm:$0xf] %vm175_vm3, %v193_v44  ;;  %v166_v46 = vadd.f32 %v190_v39, %v157_v45 }
 0x20e   :  { %v194_v47 = vpack.c.bf16 %v166_v46, %v166_v46 }
 0x210   :  { %177 = vst.msk [vmem:[%s307_s6 + $0x4] sm:$0xf] %vm175_vm3, %v194_v47 }

// kernel: fwd_with_labels.14
= control target key start
LH: loop header
LB: loop body
LE: loop exit
PB: predicated region body
PF: predicated region fallthrough
CT: control target
= control target key end

     0   :  { %s3094_s15 = smov 0   ;;  %s3096_s16 = smov 0   ;;  %s3821_s0 = inlined_call_operand.vmem [shape: bf16[2,8,3,4,8], index: 0, kind: input, shape index: {}, may-alias: {0,1,2}]   ;;  %s3822_s1 = inlined_call_operand.vmem [shape: bf16[2,8,3,4,8], index: 1, kind: input, shape index: {}, may-alias: {0,1,2}]   ;;  %s3823_s2 = inlined_call_operand.vmem [shape: bf16[2,8,3,4,8], index: 2, kind: input, shape index: {}, may-alias: {0,1,2}]   ;;  %s3824_s3 = inlined_call_operand.vmem [shape: f32[2,1,8], index: 3, kind: input, shape index: {}]   ;;  %s3825_s4 = inlined_call_operand.vmem [shape: bf16[2,8,4,8], index: 4, kind: output, shape index: {}]  }
   0x1   :  { %s3098_s17 = smov 0   ;;  %s3100_s18 = smov 0  }
   0x2   :  { %s3102_s19 = smov 0  }
   0x3 LB: > { %s26_s20 = sadd.s32 1, %s3058_s18  ;;  %p42_p1 = scmp.ne.s32.totalorder %s3050_s16, %s3046_s15  ;;  %s3062_s19 = sphi %s3102_s19, %s14_s19   ;;  %s3058_s18 = sphi %s3100_s18, %s3842_s18   ;;  %s3054_s17 = sphi %s3098_s17, %s3841_s17   ;;  %s3050_s16 = sphi %s3096_s16, %s3840_s16   ;;  %s3046_s15 = sphi %s3094_s15, %s3839_s15  }
   0x4   : > { %p28_p0 = scmp.ge.s32.totalorder %s26_s20, 2  ;;  %p43_p2 = scmp.eq.s32.totalorder %s3062_s19, 0 }
   0x5   : > { %s35_s23 = sadd.s32 1, %s3050_s16  ;;  %p2777_p5 = scmp.ge.s32.totalorder %s3062_s19, 2 }
   0x6   : > { %s3844_s20 = smov (%p28_p0, %s26_s20), 0  ;;  %p3125_p3 = por %p43_p2, %p42_p1 }
   0x7   : > { %s30_s22 = ssub.s32 %s3058_s18, %s3844_s20  ;;  %174 = sbr.rel (%p2777_p5) target bundleno = 42 (0x2a), region = 16 }
   0x8   : > { %p33_p4 = scmp.eq.s32.totalorder %s30_s22, 0 }
   0xa   : > { %s3133_s24 = scalar_select %p33_p4, %s3050_s16, %s35_s23  }
   0xc   : > { %177 = sbr.rel (!%p3125_p3) target bundleno = 22 (0x16), region = 20  ;;  %s179_s25 = sand.u32 (%p3125_p3), 1, %s3050_s16  }
   0xd   : > { %s2962_s26 = smul.u32 (%p3125_p3), 48, %s3058_s18  ;;  %s2778_s27 = sshll.u32 (%p3125_p3), %s179_s25, 4 }
   0xe   : > { %s181_s5 = scalar_lea.vmem (%p3125_p3), [#allocation2], %s2778_s27 }
   0xf   : > { %s187_s30 = scalar_lea.vmem (%p3125_p3), %s3821_s0, %s2962_s26 }
  0x10   : > { %v204_v0 = vld [vmem:[%s187_s30] sm:$0x3] (%p3125_p3)  ;;  %v206_v1 = vld [vmem:[%s187_s30 + $0x6] sm:$0x3] (%p3125_p3)  ;;  %v208_v2 = vld [vmem:[%s187_s30 + $0xc] sm:$0x3] (%p3125_p3) }
  0x11   : > { %205 = vst [vmem:[%s181_s5] sm:$0x3] %v204_v0  ;;  %207 = vst [vmem:[%s181_s5 + $0x2] sm:$0x3] %v206_v1  ;;  %v210_v3 = vld [vmem:[%s187_s30 + $0x12] sm:$0x3] }
  0x12   : > { %209 = vst [vmem:[%s181_s5 + $0x4] sm:$0x3] %v208_v2  ;;  %v212_v4 = vld [vmem:[%s187_s30 + $0x18] sm:$0x3]  ;;  %v214_v5 = vld [vmem:[%s187_s30 + $0x1e] sm:$0x3] }
  0x13   : > { %211 = vst [vmem:[%s181_s5 + $0x6] sm:$0x3] %v210_v3  ;;  %213 = vst [vmem:[%s181_s5 + $0x8] sm:$0x3] %v212_v4  ;;  %v216_v6 = vld [vmem:[%s187_s30 + $0x24] sm:$0x3] }
  0x14   : > { %215 = vst [vmem:[%s181_s5 + $0xa] sm:$0x3] %v214_v5  ;;  %v218_v7 = vld [vmem:[%s187_s30 + $0x2a] sm:$0x3]  ;;  %217 = vst [vmem:[%s181_s5 + $0xc] sm:$0x3] %v216_v6 }
  0x15   : > { %219 = vst [vmem:[%s181_s5 + $0xe] sm:$0x3] %v218_v7 }
  0x16 PF: > { %259 = sbr.rel (!%p3125_p3) target bundleno = 32 (0x20), region = 61  ;;  %s261_s6 = sand.u32 (%p3125_p3), 1, %s3050_s16  }
  0x17   : > { %s2781_s7 = smul.u32 (%p3125_p3), 48, %s3058_s18  ;;  %s2780_s8 = sshll.u32 (%p3125_p3), %s261_s6, 4 }
  0x18   : > { %s263_s12 = scalar_lea.vmem (%p3125_p3), [#allocation3], %s2780_s8 }
  0x19   : > { %s2676_s11 = scalar_lea.vmem (%p3125_p3), %s3822_s1, %s2781_s7 }
  0x1a   : > { %v2782_v8 = vld [vmem:[%s2676_s11 + $0x2] sm:$0x3] (%p3125_p3)  ;;  %v2783_v9 = vld [vmem:[%s2676_s11 + $0x8] sm:$0x3] (%p3125_p3)  ;;  %v2784_v10 = vld [vmem:[%s2676_s11 + $0xe] sm:$0x3] (%p3125_p3) }
  0x1b   : > { %285 = vst [vmem:[%s263_s12] sm:$0x3] %v2782_v8  ;;  %287 = vst [vmem:[%s263_s12 + $0x2] sm:$0x3] %v2783_v9  ;;  %v2785_v11 = vld [vmem:[%s2676_s11 + $0x14] sm:$0x3] }
  0x1c   : > { %289 = vst [vmem:[%s263_s12 + $0x4] sm:$0x3] %v2784_v10  ;;  %v2786_v12 = vld [vmem:[%s2676_s11 + $0x1a] sm:$0x3]  ;;  %v2787_v13 = vld [vmem:[%s2676_s11 + $0x20] sm:$0x3] }
  0x1d   : > { %291 = vst [vmem:[%s263_s12 + $0x6] sm:$0x3] %v2785_v11  ;;  %293 = vst [vmem:[%s263_s12 + $0x8] sm:$0x3] %v2786_v12  ;;  %v2788_v14 = vld [vmem:[%s2676_s11 + $0x26] sm:$0x3] }
  0x1e   : > { %295 = vst [vmem:[%s263_s12 + $0xa] sm:$0x3] %v2787_v13  ;;  %v2789_v15 = vld [vmem:[%s2676_s11 + $0x2c] sm:$0x3]  ;;  %297 = vst [vmem:[%s263_s12 + $0xc] sm:$0x3] %v2788_v14 }
  0x1f   : > { %299 = vst [vmem:[%s263_s12 + $0xe] sm:$0x3] %v2789_v15 }
  0x20 PF: > { %339 = sbr.rel (!%p3125_p3) target bundleno = 42 (0x2a), region = 102  ;;  %s341_s13 = sand.u32 (%p3125_p3), 1, %s3050_s16  }
  0x21   : > { %s2791_s14 = smul.u32 (%p3125_p3), 48, %s3058_s18  ;;  %s2790_s22 = sshll.u32 (%p3125_p3), %s341_s13, 4 }
  0x22   : > { %s343_s27 = scalar_lea.vmem (%p3125_p3), [#allocation4], %s2790_s22 }
  0x23   : > { %s2682_s26 = scalar_lea.vmem (%p3125_p3), %s3823_s2, %s2791_s14 }
  0x24   : > { %v2792_v16 = vld [vmem:[%s2682_s26 + $0x4] sm:$0x3] (%p3125_p3)  ;;  %v2793_v17 = vld [vmem:[%s2682_s26 + $0xa] sm:$0x3] (%p3125_p3)  ;;  %v2794_v18 = vld [vmem:[%s2682_s26 + $0x10] sm:$0x3] (%p3125_p3) }
  0x25   : > { %365 = vst [vmem:[%s343_s27] sm:$0x3] %v2792_v16  ;;  %367 = vst [vmem:[%s343_s27 + $0x2] sm:$0x3] %v2793_v17  ;;  %v2795_v19 = vld [vmem:[%s2682_s26 + $0x16] sm:$0x3] }
  0x26   : > { %369 = vst [vmem:[%s343_s27 + $0x4] sm:$0x3] %v2794_v18  ;;  %v2796_v20 = vld [vmem:[%s2682_s26 + $0x1c] sm:$0x3]  ;;  %v2797_v21 = vld [vmem:[%s2682_s26 + $0x22] sm:$0x3] }
  0x27   : > { %371 = vst [vmem:[%s343_s27 + $0x6] sm:$0x3] %v2795_v19  ;;  %373 = vst [vmem:[%s343_s27 + $0x8] sm:$0x3] %v2796_v20  ;;  %v2798_v22 = vld [vmem:[%s2682_s26 + $0x28] sm:$0x3] }
  0x28   : > { %375 = vst [vmem:[%s343_s27 + $0xa] sm:$0x3] %v2797_v21  ;;  %v2799_v23 = vld [vmem:[%s2682_s26 + $0x2e] sm:$0x3]  ;;  %377 = vst [vmem:[%s343_s27 + $0xc] sm:$0x3] %v2798_v22 }
  0x29   : > { %379 = vst [vmem:[%s343_s27 + $0xe] sm:$0x3] %v2799_v23 }
  0x2a PF: > { %p2800_p6 = scmp.ge.s32.totalorder %s3062_s19, 1  ;;  %p424_p7 = scmp.lt.s32.totalorder %s3062_s19, 3 }
  0x2c   : > { %p425_p8 = pnand %p2800_p6, %p424_p7 }
  0x2d   : > { %s431_s21 = sand.u32 (!%p425_p8), 1, %s3046_s15   ;;  %p486_p9 = scmp.lt.s32.totalorder (!%p425_p8), %s3054_s17, 1 }
  0x2e   : > { %428 = sbr.rel (%p425_p8) target bundleno = 1341 (0x53d), region = 147  ;;  %s3161_s28 = sshll.u32 (!%p425_p8), %s431_s21, 4 }
  0x2f   : > { %s3165_s29 = scalar_lea.vmem (!%p425_p8), [#allocation3], %s3161_s28  ;;  %s3199_s15 = scalar_lea.vmem (!%p425_p8), [#allocation2], %s3161_s28 }
  0x30   : > { %s3279_s7 = scalar_lea.vmem (!%p425_p8), [#allocation4], %s3161_s28 }
  0x33   : > { %v3064_v24 = vmov 0.0   ;;  %v3168_v25 = vld.sshfl [vmem:[%s3165_s29] sm:$0x1 pattern:$0x76325410]  ;;  %vm3065_vm0 = vmmov 0   ;;  %v551_v29 = vlaneseq }
  0x34   : > { %2914 = vmatprep.subr.bf16.mxu0 %v3064_v24  ;;  %2920 = vmatprep.subr.bf16.mxu1 %v3064_v24  ;;  %v3175_v26 = vld.sshfl [vmem:[%s3165_s29 + $0x2] sm:$0x1 pattern:$0x76325410]  ;;  %v3066_v27 = vmov 1983009808   ;;  %v698_v31 = vunpack.c.l.b16 %v3168_v25 }
  0x35   : > { %2916 = vmatprep.mubr.msk.bf16.mxu0 %vm3065_vm0, %v3064_v24  ;;  %2922 = vmatprep.mubr.msk.bf16.mxu1 %vm3065_vm0, %v3064_v24  ;;  %v549_v28 = vunpack.c.l.s4 %v3066_v27  ;;  %v3178_v30 = vld.sshfl [vmem:[%s3165_s29 + $0x4] sm:$0x1 pattern:$0x76325410]  ;;  %vm613_vm1 = vcmask 1041409   ;;  %v699_v32 = vunpack.c.l.b16 %v3175_v26  ;;  %vm616_vm2 = vcmask 1042434  }
  0x36   : > { %v3183_v33 = vld.sshfl [vmem:[%s3165_s29 + $0x6] sm:$0x1 pattern:$0x76325410]  ;;  %vm619_vm3 = vcmask 1043459   ;;  %v700_v34 = vunpack.c.l.b16 %v3178_v30  ;;  %vm622_vm4 = vcmask 1044484  }
  0x37   : > { %v3187_v35 = vld.sshfl [vmem:[%s3165_s29 + $0x8] sm:$0x1 pattern:$0x76325410]  ;;  %v701_v36 = vunpack.c.l.b16 %v3183_v33  ;;  %v706_v37 = vrot.slane %v699_v32, 7  ;;  %v550_v43 = vunpack.c.0.s8 %v549_v28  ;;  %v3203_v44 = vshrl.u32 %v551_v29, 7 }
  0x38   : > { %v3193_v38 = vld.sshfl [vmem:[%s3165_s29 + $0xa] sm:$0x1 pattern:$0x76325410]  ;;  %v702_v39 = vunpack.c.l.b16 %v3187_v35  ;;  %v708_v40 = vrot.slane %v700_v34, 6  ;;  %vm625_vm5 = vcmask 1045509  }
  0x39   : > { %v502_v41 = vld [vmem:[%s3199_s15] sm:$0x1]  ;;  %v503_v42 = vld [vmem:[%s3199_s15 + $0x2] sm:$0x1]  ;;  %v703_v46 = vunpack.c.l.b16 %v3193_v38  ;;  %v707_v47 = vsel %vm613_vm1, %v706_v37, %v698_v31  ;;  %v710_v48 = vrot.slane %v701_v36, 5  ;;  %vm628_vm6 = vcmask 1046534  }
  0x3a   : > { %v3206_v45 = vld.sshfl [vmem:[%s3165_s29 + $0xc] sm:$0x1 pattern:$0x76325410]  ;;  %v504_v49 = vld [vmem:[%s3199_s15 + $0x4] sm:$0x1]  ;;  %v709_v53 = vsel %vm616_vm2, %v708_v40, %v707_v47  ;;  %v3235_v0 = vsub.s32 %v550_v43, %v3203_v44 }
  0x3b   : > { %v505_v50 = vld [vmem:[%s3199_s15 + $0x6] sm:$0x1]  ;;  %v3217_v51 = vld.sshfl [vmem:[%s3165_s29 + $0xe] sm:$0x1 pattern:$0x76325410]  ;;  %v704_v52 = vunpack.c.l.b16 %v3206_v45  ;;  %v711_v56 = vsel %vm619_vm3, %v710_v48, %v709_v53 }
  0x3c   : > { %v712_v54 = vrot.slane %v702_v39, 4  ;;  %vm631_vm7 = vcmask 1047559   ;;  %v705_v55 = vunpack.c.l.b16 %v3217_v51  ;;  %v714_v57 = vrot.slane %v703_v46, 3  ;;  %v506_v58 = vld [vmem:[%s3199_s15 + $0x8] sm:$0x1]  ;;  %s3846_s17 = smov (!%p486_p9, %s3054_s17), 1 }
  0x3d   : > { %v507_v59 = vld [vmem:[%s3199_s15 + $0xa] sm:$0x1]  ;;  %v716_v61 = vrot.slane %v704_v52, 2  ;;  %vm721_vm8 = vcmask 64512   ;;  %v508_v62 = vld [vmem:[%s3199_s15 + $0xc] sm:$0x1]  ;;  %s488_s6 = scalar_lea.vmem %s3824_s3, %s3846_s17 }
  0x3e   : > { %v713_v60 = vsel %vm622_vm4, %v712_v54, %v711_v56  ;;  %v509_v63 = vld [vmem:[%s3199_s15 + $0xe] sm:$0x1]  ;;  %v718_v2 = vrot.slane %v705_v55, 1  ;;  %v510_v3 = vmul.bf16 1052065461, %v502_v41  ;;  %vm870_vm9 = vcmask 1043456  }
  0x3f   : > { %v715_v1 = vsel %vm625_vm5, %v714_v57, %v713_v60  ;;  %v511_v4 = vmul.bf16 1052065461, %v503_v42  ;;  %v512_v6 = vmul.bf16 1052065461, %v504_v49  ;;  %v513_v7 = vmul.bf16 1052065461, %v505_v50 }
  0x40   : > { %v717_v5 = vsel %vm628_vm6, %v716_v61, %v715_v1  ;;  %v514_v8 = vmul.bf16 1052065461, %v506_v58  ;;  %v515_v10 = vmul.bf16 1052065461, %v507_v59  ;;  %v516_v11 = vmul.bf16 1052065461, %v508_v62 }
  0x41   : > { %v719_v9 = vsel %vm631_vm7, %v718_v2, %v717_v5  ;;  %v517_v12 = vmul.bf16 1052065461, %v509_v63  ;;  %v554_v14 = vrot.slane %v510_v3, %v3235_v0  ;;  %v561_v15 = vrot.slane %v511_v4, %v3235_v0  ;;  %v3270_v1 = vld [vmem:[%s488_s6] ss:$0 sm:$0xff]  ;;  %s2897_s8 = sshll.u32 %s3846_s17, 4 }
  0x42   : > { %v720_v13 = vpack.c.b16 %v719_v9, %v719_v9  ;;  %v568_v16 = vrot.slane %v512_v6, %v3235_v0  ;;  %v575_v17 = vrot.slane %v513_v7, %v3235_v0  ;;  %v582_v18 = vrot.slane %v514_v8, %v3235_v0  ;;  %s3532_s11 = scalar_lea.vmem %s3825_s4, %s2897_s8 }
  0x43   : > { %v589_v19 = vrot.slane %v515_v10, %v3235_v0  ;;  %v596_v20 = vrot.slane %v516_v11, %v3235_v0  ;;  %v603_v22 = vrot.slane %v517_v12, %v3235_v0  ;;  %v604_v23 = vunpack.c.l.b16 %v554_v14  ;;  %v3285_v14 = vld.sshfl [vmem:[%s3279_s7 + $0x2] sm:$0x1 pattern:$0x76325410] }
  0x44   : > { %v726_v21 = vsel %vm721_vm8, %v720_v13, 0  ;;  %v605_v27 = vunpack.c.l.b16 %v561_v15  ;;  %v606_v28 = vunpack.c.l.b16 %v568_v16  ;;  %v607_v29 = vunpack.c.l.b16 %v575_v17  ;;  %v3282_v13 = vld.sshfl [vmem:[%s3279_s7] sm:$0x1 pattern:$0x76325410] }
  0x45   : > { %2915 = vmatpush3.bf16.xpose.msra.mxu0 %v726_v21  ;;  %v608_v37 = vunpack.c.l.b16 %v582_v18  ;;  %v609_v40 = vunpack.c.l.b16 %v589_v19  ;;  %v610_v41 = vunpack.c.l.b16 %v596_v20  ;;  %v611_v42 = vunpack.c.l.b16 %v603_v22  ;;  %v3288_v15 = vld.sshfl [vmem:[%s3279_s7 + $0x4] sm:$0x1 pattern:$0x76325410] }
  0x46   : > { %v612_v43 = vrot.slane %v605_v27, 7  ;;  %2932 = vmatprep.subr.bf16.mxu0 %v3064_v24  ;;  %v615_v47 = vrot.slane %v606_v28, 6  ;;  %v618_v48 = vrot.slane %v607_v29, 5  ;;  %v844_v16 = vunpack.c.l.b16 %v3282_v13 }
  0x47   : > { %v621_v49 = vrot.slane %v608_v37, 4  ;;  %v624_v53 = vrot.slane %v609_v40, 3  ;;  %v627_v56 = vrot.slane %v610_v41, 2  ;;  %v630_v58 = vrot.slane %v611_v42, 1 }
  0x48   : > { %v614_v50 = vsel %vm613_vm1, %v612_v43, %v604_v23  ;;  %v845_v17 = vunpack.c.l.b16 %v3285_v14  ;;  %v3293_v18 = vld.sshfl [vmem:[%s3279_s7 + $0x6] sm:$0x1 pattern:$0x76325410]  ;;  %v846_v19 = vunpack.c.l.b16 %v3288_v15  ;;  %v1244_v30 = vrot.slane %v702_v39, 5 }
  0x49   : > { %v617_v54 = vsel %vm616_vm2, %v615_v47, %v614_v50  ;;  %v3297_v20 = vld.sshfl [vmem:[%s3279_s7 + $0x8] sm:$0x1 pattern:$0x76325410]  ;;  %v847_v21 = vunpack.c.l.b16 %v3293_v18  ;;  %v1250_v45 = vrot.slane %v705_v55, 2  ;;  %vm1020_vm10 = vcmask 57344  }
  0x4a   : > { %v620_v57 = vsel %vm619_vm3, %v618_v48, %v617_v54  ;;  %v852_v22 = vrot.slane %v845_v17, 7  ;;  %v3303_v23 = vld.sshfl [vmem:[%s3279_s7 + $0xa] sm:$0x1 pattern:$0x76325410]  ;;  %v848_v27 = vunpack.c.l.b16 %v3297_v20  ;;  %v854_v28 = vrot.slane %v846_v19, 6 }
  0x4b   : > { %v623_v59 = vsel %vm622_vm4, %v621_v49, %v620_v57  ;;  %v3309_v29 = vld.sshfl [vmem:[%s3279_s7 + $0xc] sm:$0x1 pattern:$0x76325410]  ;;  %v849_v37 = vunpack.c.l.b16 %v3303_v23  ;;  %v856_v41 = vrot.slane %v847_v21, 5  ;;  %vm2079_vm15 = vcmask 58369  }
  0x4c   : > { %v626_v60 = vsel %vm625_vm5, %v624_v53, %v623_v59  ;;  %v853_v40 = vsel %vm613_vm1, %v852_v22, %v844_v16  ;;  %v3318_v42 = vld.sshfl [vmem:[%s3279_s7 + $0xe] sm:$0x1 pattern:$0x76325410]  ;;  %v3827_v43 = vunpack.c.l.b16 %v3309_v29  ;;  %v858_v48 = vrot.slane %v848_v27, 4 }
  0x4d   : > { %v629_v61 = vsel %vm628_vm6, %v627_v56, %v626_v60  ;;  %v855_v47 = vsel %vm616_vm2, %v854_v28, %v853_v40  ;;  %v3826_v49 = vunpack.c.l.b16 %v3318_v42  ;;  %v860_v53 = vrot.slane %v849_v37, 3  ;;  %v1052_v28 = vld [vmem:[%s3199_s15 + $0xa] sm:$0x1] }
  0x4e   : > { %v632_v62 = vsel %vm631_vm7, %v630_v58, %v629_v61  ;;  %v857_v50 = vsel %vm619_vm3, %v856_v41, %v855_v47  ;;  %v862_v56 = vrot.slane %v3827_v43, 2  ;;  %v3364_v40 = vld.sshfl [vmem:[%s3165_s29] sm:$0x2 pattern:$0x76325410]  ;;  %v3831_v15 = vunpack.c.l.b16 %v3309_v29 }
  0x4f   : > { %v633_v63 = vpack.c.b16 %v632_v62, %v632_v62  ;;  %v859_v54 = vsel %vm622_vm4, %v858_v48, %v857_v50  ;;  %v864_v58 = vrot.slane %v3826_v49, 1  ;;  %v3367_v47 = vld.sshfl [vmem:[%s3165_s29 + $0x2] sm:$0x2 pattern:$0x76325410]  ;;  %v1248_v48 = vrot.slane %v704_v52, 3 }
  0x50   : > { %v861_v57 = vsel %vm625_vm5, %v860_v53, %v859_v54  ;;  %v1053_v50 = vld [vmem:[%s3199_s15 + $0xc] sm:$0x1]  ;;  %v1054_v53 = vld [vmem:[%s3199_s15 + $0xe] sm:$0x1]  ;;  %v1060_v54 = vmul.bf16 1052065461, %v1052_v28 }
  0x51   : > { %2917 = vmatmul.mubr.msk.bf16.vlgmr.msra.gmra.mxu0 %vm721_vm8, %v633_v63  ;;  %v863_v59 = vsel %vm628_vm6, %v862_v56, %v861_v57  ;;  %v1238_v63 = vrot.slane %v698_v31, 1  ;;  %v1061_v52 = vmul.bf16 1052065461, %v1053_v50  ;;  %vm1021_vm11 = vsmask.f32 256 }
  0x52   : > { %2934 = vmatprep.mubr.msk.bf16.mxu0 %vm3065_vm0, %v3064_v24  ;;  %v865_v60 = vsel %vm631_vm7, %v864_v58, %v863_v59  ;;  %v1759_v59 = vunpack.c.l.b16 %v3364_v40  ;;  %v3406_v50 = vld.sshfl [vmem:[%s3165_s29 + $0xa] sm:$0x2 pattern:$0x76325410]  ;;  %vm3539_vm12 = vmand %vm1020_vm10, %vm1021_vm11  ;;  %vm1550_vm13 = vsmask.f32 7938 }
  0x53   : > { %v866_v61 = vpack.c.b16 %v865_v60, %v865_v60  ;;  %v1760_v60 = vunpack.c.l.b16 %v3367_v47  ;;  %vm3665_vm14 = vmand %vm1020_vm10, %vm1550_vm13 }
  0x54   : > { %v1767_v51 = vrot.slane %v1759_v59, 2 }
  0x55   : > { %v872_v62 = vsel %vm870_vm9, %v866_v61, 0  ;;  %v1768_v55 = vrot.slane %v1760_v60, 1 }
  0x56   : > { %2921 = vmatpush3.bf16.msra.mxu1 %v872_v62 }
  0x57   : > { %2926 = vmatprep.subr.bf16.mxu1 %v3064_v24 }
 0x111   : > { %v762_v2 = vpop.f32.mrf.mxu0 }
 0x112   : > { %v763_v3 = vadd.f32 %v3270_v1, %v762_v2  ;;  %v1047_v2 = vld [vmem:[%s3199_s15] sm:$0x1] }
 0x113   : > { %v2918_v4 = vpop.f32.mrf.mxu0 }
 0x114   : > { %v768_v5 = vsel %vm721_vm8, %v763_v3, -inf  ;;  %v1239_v4 = vsel %vm613_vm1, %v699_v32, %v1238_v63  ;;  %v1062_v63 = vmul.bf16 1052065461, %v1054_v53 }
 0x115   : > { %769 = vmax.xlane.f32.xlu0 %v768_v5  ;;  %v765_v6 = vpop.f32.mrf.mxu0  ;;  %v1049_v5 = vld [vmem:[%s3199_s15 + $0x4] sm:$0x1] }
 0x116   : > { %v1055_v6 = vmul.bf16 1052065461, %v1047_v2  ;;  %v1057_v31 = vmul.bf16 1052065461, %v1049_v5  ;;  %v1142_v28 = vrot.slane %v1062_v63, %v3235_v0 }
 0x117   : > { %v2919_v7 = vpop.f32.mrf.mxu0  ;;  %v3385_v5 = vld.sshfl [vmem:[%s3165_s29 + $0x6] sm:$0x2 pattern:$0x76325410] }
 0x118   : > { %v1242_v7 = vrot.slane %v701_v36, 6  ;;  %v1093_v32 = vrot.slane %v1055_v6, %v3235_v0  ;;  %v1246_v36 = vrot.slane %v703_v46, 4  ;;  %v1128_v6 = vrot.slane %v1060_v54, %v3235_v0  ;;  %v1579_v54 = vld [vmem:[%s3199_s15 + $0x6] sm:$0x2] }
 0x119   : > { %v1150_v63 = vunpack.c.l.b16 %v1142_v28 }
 0x11a   : > { %v1143_v39 = vunpack.c.l.b16 %v1093_v32  ;;  %v3398_v32 = vld.sshfl [vmem:[%s3165_s29 + $0x8] sm:$0x2 pattern:$0x76325410] }
 0x11c   : > { %v1151_v58 = vrot.slane %v1143_v39, 1  ;;  %v1769_v39 = vsel %vm613_vm1, %v1768_v55, %v1767_v51  ;;  %v1764_v55 = vunpack.c.l.b16 %v3406_v50 }
 0x19e   : > { %v770_v8 = vpop.xlane.xlu0 %769 }
 0x19f   : > { %v771_v9 = vsub.f32 %v763_v3, %v770_v8  ;;  %v1240_v3 = vrot.slane %v700_v34, 7  ;;  %v1048_v8 = vld [vmem:[%s3199_s15 + $0x2] sm:$0x1] }
 0x1a0   : > { %v1056_v26 = vmul.bf16 1052065461, %v1048_v8  ;;  %v1576_v8 = vld [vmem:[%s3199_s15] sm:$0x2] }
 0x1a1   : > { %v772_v10 = vmul.f32 1.442695, %v771_v9  ;;  %v1241_v25 = vsel %vm616_vm2, %v1240_v3, %v1239_v4  ;;  %v1050_v9 = vld [vmem:[%s3199_s15 + $0x6] sm:$0x1] }
 0x1a2   : > { %v1243_v34 = vsel %vm619_vm3, %v1242_v7, %v1241_v25  ;;  %v1058_v33 = vmul.bf16 1052065461, %v1050_v9  ;;  %v1100_v35 = vrot.slane %v1056_v26, %v3235_v0  ;;  %v3382_v3 = vld.sshfl [vmem:[%s3165_s29 + $0x4] sm:$0x2 pattern:$0x76325410] }
 0x1a3   : > { %3008 = vpow2.f32 %v772_v10  ;;  %v1051_v10 = vld [vmem:[%s3199_s15 + $0x8] sm:$0x1]  ;;  %v1245_v22 = vsel %vm622_vm4, %v1244_v30, %v1243_v34  ;;  %v1577_v25 = vld [vmem:[%s3199_s15 + $0x2] sm:$0x2]  ;;  %v1762_v34 = vunpack.c.l.b16 %v3385_v5  ;;  %v2305_v5 = vrot.slane %v1764_v55, 6 }
 0x1a4   : > { %v1059_v41 = vmul.bf16 1052065461, %v1051_v10  ;;  %v1114_v38 = vrot.slane %v1058_v33, %v3235_v0  ;;  %v1247_v46 = vsel %vm625_vm5, %v1246_v36, %v1245_v22  ;;  %v1144_v57 = vunpack.c.l.b16 %v1100_v35 }
 0x1a5   : > { %v1249_v62 = vsel %vm628_vm6, %v1248_v48, %v1247_v46  ;;  %v1761_v33 = vunpack.c.l.b16 %v3382_v3  ;;  %v1584_v36 = vmul.bf16 1052065461, %v1576_v8  ;;  %v1148_v35 = vunpack.c.l.b16 %v1128_v6  ;;  %v2106_v3 = vld [vmem:[%s3199_s15] sm:$0x2]  ;;  %v1580_v8 = vld [vmem:[%s3199_s15 + $0x8] sm:$0x2] }
 0x1a6   : > { %v1121_v61 = vrot.slane %v1059_v41, %v3235_v0  ;;  %v1146_v2 = vunpack.c.l.b16 %v1114_v38  ;;  %v1152_v7 = vsel %vm613_vm1, %v1144_v57, %v1151_v58  ;;  %v1251_v9 = vsel %vm631_vm7, %v1250_v45, %v1249_v62  ;;  %v3417_v57 = vld.sshfl [vmem:[%s3165_s29 + $0xe] sm:$0x2 pattern:$0x76325410]  ;;  %v1578_v45 = vld [vmem:[%s3199_s15 + $0x4] sm:$0x2] }
 0x1a7   : > { %v1252_v22 = vpack.c.b16 %v1251_v9, %v1251_v9  ;;  %v1763_v46 = vunpack.c.l.b16 %v3398_v32  ;;  %v1771_v53 = vrot.slane %v1762_v34, 7  ;;  %v1770_v58 = vsel %vm616_vm2, %v1761_v33, %v1769_v39 }
 0x1a8   : > { %v1147_v30 = vunpack.c.l.b16 %v1121_v61  ;;  %v1155_v26 = vrot.slane %v1146_v2, 6  ;;  %v1159_v2 = vrot.slane %v1148_v35, 4 }
 0x1a9   : > { %v3424_v62 = vsel %vm721_vm8, %v1252_v22, 0  ;;  %v1772_v9 = vsel %vm619_vm3, %v1771_v53, %v1770_v58  ;;  %v2114_v22 = vmul.bf16 1052065461, %v2106_v3  ;;  %v2298_v58 = vrot.slane %v1760_v60, 2 }
 0x1aa   : > { %v1157_v48 = vrot.slane %v1147_v30, 5  ;;  %v1581_v30 = vld [vmem:[%s3199_s15 + $0xa] sm:$0x2] }
 0x1b0   : > { %v3274_v11 = vpop.eup %3008 }
 0x1b1   : > { %v774_v12 = vsel %vm721_vm8, %v3274_v11, 0.0 }
 0x1b2   : > { %775 = vadd.xlane.f32.xlu0 %v774_v12  ;;  %v1107_v12 = vrot.slane %v1057_v31, %v3235_v0  ;;  %v1135_v31 = vrot.slane %v1061_v52, %v3235_v0  ;;  %v1622_v52 = vrot.slane %v1584_v36, %v3235_v0 }
 0x1b4   : > { %v1145_v56 = vunpack.c.l.b16 %v1107_v12  ;;  %v1585_v12 = vmul.bf16 1052065461, %v1577_v25  ;;  %v1149_v41 = vunpack.c.l.b16 %v1135_v31  ;;  %v1587_v25 = vmul.bf16 1052065461, %v1579_v54 }
 0x1b5   : > { %v1773_v31 = vrot.slane %v1763_v46, 6  ;;  %v2297_v54 = vrot.slane %v1759_v59, 3  ;;  %v1163_v59 = vrot.slane %v1150_v63, 2 }
 0x1b6   : > { %v1153_v4 = vrot.slane %v1145_v56, 7  ;;  %v3414_v56 = vld.sshfl [vmem:[%s3165_s29 + $0xc] sm:$0x2 pattern:$0x76325410]  ;;  %v1629_v61 = vrot.slane %v1585_v12, %v3235_v0  ;;  %v1161_v51 = vrot.slane %v1149_v41, 3  ;;  %v1766_v41 = vunpack.c.l.b16 %v3417_v57 }
 0x1b7   : > { %v2108_v12 = vld [vmem:[%s3199_s15 + $0x4] sm:$0x2]  ;;  %v1765_v39 = vunpack.c.l.b16 %v3414_v56  ;;  %v1643_v53 = vrot.slane %v1587_v25, %v3235_v0 }
 0x1b8   : > { %v1154_v10 = vsel %vm616_vm2, %v1153_v4, %v1152_v7  ;;  %v2107_v4 = vld [vmem:[%s3199_s15 + $0x2] sm:$0x2]  ;;  %v1673_v36 = vunpack.c.l.b16 %v1629_v61  ;;  %v1589_v61 = vmul.bf16 1052065461, %v1581_v30  ;;  %v2116_v3 = vmul.bf16 1052065461, %v2108_v12 }
 0x1b9   : > { %v1156_v38 = vsel %vm619_vm3, %v1155_v26, %v1154_v10  ;;  %v1586_v26 = vmul.bf16 1052065461, %v1578_v45  ;;  %v1672_v10 = vunpack.c.l.b16 %v1622_v52  ;;  %v2115_v28 = vmul.bf16 1052065461, %v2107_v4  ;;  %v1582_v52 = vld [vmem:[%s3199_s15 + $0xc] sm:$0x2] }
 0x1ba   : > { %v1158_v7 = vsel %vm622_vm4, %v1157_v48, %v1156_v38  ;;  %v1588_v48 = vmul.bf16 1052065461, %v1580_v8  ;;  %v1775_v38 = vrot.slane %v1764_v55, 5  ;;  %v1774_v45 = vsel %vm622_vm4, %v1773_v31, %v1772_v9  ;;  %v1583_v9 = vld [vmem:[%s3199_s15 + $0xe] sm:$0x2] }
 0x1bb   : > { %v1160_v35 = vsel %vm625_vm5, %v1159_v2, %v1158_v7  ;;  %v1636_v2 = vrot.slane %v1586_v26, %v3235_v0  ;;  %v1680_v4 = vrot.slane %v1672_v10, 2  ;;  %v2152_v7 = vrot.slane %v2114_v22, %v3235_v0  ;;  %v2110_v10 = vld [vmem:[%s3199_s15 + $0x8] sm:$0x2]  ;;  %v2109_v22 = vld [vmem:[%s3199_s15 + $0x6] sm:$0x2] }
 0x1bc   : > { %v2159_v40 = vrot.slane %v2115_v28, %v3235_v0  ;;  %v1777_v47 = vrot.slane %v1765_v39, 4  ;;  %v1650_v60 = vrot.slane %v1588_v48, %v3235_v0  ;;  %v2300_v8 = vrot.slane %v1761_v33, 1 }
 0x1bd   : > { %v1162_v25 = vsel %vm628_vm6, %v1161_v51, %v1160_v35  ;;  %v1590_v31 = vmul.bf16 1052065461, %v1582_v52  ;;  %v1675_v30 = vunpack.c.l.b16 %v1643_v53  ;;  %v2299_v26 = vsel %vm613_vm1, %v2298_v58, %v2297_v54  ;;  %v2111_v58 = vld [vmem:[%s3199_s15 + $0xa] sm:$0x2] }
 0x1be   : > { %v1657_v12 = vrot.slane %v1589_v61, %v3235_v0  ;;  %v1674_v63 = vunpack.c.l.b16 %v1636_v2  ;;  %v2166_v28 = vrot.slane %v2116_v3, %v3235_v0  ;;  %v1779_v33 = vrot.slane %v1766_v41, 3 }
 0x1bf   : > { %v2202_v35 = vunpack.c.l.b16 %v2152_v7  ;;  %v2203_v48 = vunpack.c.l.b16 %v2159_v40  ;;  %v1591_v53 = vmul.bf16 1052065461, %v1583_v9  ;;  %v1676_v52 = vunpack.c.l.b16 %v1650_v60  ;;  %v2112_v60 = vld [vmem:[%s3199_s15 + $0xc] sm:$0x2] }
 0x1c0   : > { %v2301_v54 = vsel %vm616_vm2, %v2300_v8, %v2299_v26  ;;  %v1664_v61 = vrot.slane %v1590_v31, %v3235_v0  ;;  %v1684_v2 = vrot.slane %v1675_v30, 7  ;;  %v2117_v3 = vmul.bf16 1052065461, %v2109_v22 }
 0x1c1   : > { %v1677_v49 = vunpack.c.l.b16 %v1657_v12  ;;  %v2302_v40 = vsel %vm619_vm3, %v1762_v34, %v2301_v54  ;;  %v2119_v8 = vmul.bf16 1052065461, %v2111_v58  ;;  %v2211_v9 = vrot.slane %v2203_v48, 2 }
 0x1c2   : > { %v1671_v30 = vrot.slane %v1591_v53, %v3235_v0  ;;  %v1686_v26 = vrot.slane %v1676_v52, 6  ;;  %v1678_v32 = vunpack.c.l.b16 %v1664_v61  ;;  %v2120_v22 = vmul.bf16 1052065461, %v2112_v60 }
 0x1c3   : > { %v2307_v55 = vrot.slane %v1765_v39, 5 }
 0x23b   : > { %v776_v6 = vpop.xlane.xlu0 %775 }
 0x23c   : > { %3010 = vrcp.f32 %v776_v6  ;;  %v1681_v6 = vrot.slane %v1673_v36, 1  ;;  %v1776_v36 = vsel %vm625_vm5, %v1775_v38, %v1774_v45  ;;  %v2118_v38 = vmul.bf16 1052065461, %v2110_v10 }
 0x23d   : > { %v1778_v45 = vsel %vm628_vm6, %v1777_v47, %v1776_v36  ;;  %v2210_v47 = vrot.slane %v2202_v35, 3  ;;  %v2173_v36 = vrot.slane %v2117_v3, %v3235_v0  ;;  %v2187_v35 = vrot.slane %v2119_v8, %v3235_v0 }
 0x23e   : > { %v1682_v51 = vsel %vm613_vm1, %v1681_v6, %v1680_v4  ;;  %v2303_v4 = vrot.slane %v1763_v46, 7  ;;  %v2204_v6 = vunpack.c.l.b16 %v2166_v28  ;;  %v2180_v10 = vrot.slane %v2118_v38, %v3235_v0 }
 0x23f   : > { %v1683_v43 = vsel %vm616_vm2, %v1674_v63, %v1682_v51  ;;  %v2113_v63 = vld [vmem:[%s3199_s15 + $0xe] sm:$0x2]  ;;  %v1688_v51 = vrot.slane %v1677_v49, 5  ;;  %v2212_v48 = vsel %vm613_vm1, %v2211_v9, %v2210_v47  ;;  %v1679_v49 = vunpack.c.l.b16 %v1671_v30 }
 0x240   : > { %v1685_v46 = vsel %vm619_vm3, %v1684_v2, %v1683_v43  ;;  %v2304_v12 = vsel %vm622_vm4, %v2303_v4, %v2302_v40  ;;  %v2213_v28 = vrot.slane %v2204_v6, 1  ;;  %v1164_v43 = vsel %vm631_vm7, %v1163_v59, %v1162_v25 }
 0x241   : > { %v1687_v50 = vsel %vm622_vm4, %v1686_v26, %v1685_v46  ;;  %v2206_v53 = vunpack.c.l.b16 %v2180_v10  ;;  %v2121_v52 = vmul.bf16 1052065461, %v2113_v63  ;;  %v2205_v54 = vunpack.c.l.b16 %v2173_v36 }
 0x242   : > { %v1690_v59 = vrot.slane %v1678_v32, 4  ;;  %v2194_v25 = vrot.slane %v2120_v22, %v3235_v0  ;;  %v2214_v56 = vsel %vm616_vm2, %v2213_v28, %v2212_v48  ;;  %v1689_v39 = vsel %vm625_vm5, %v1688_v51, %v1687_v50 }
 0x243   : > { %v2207_v38 = vunpack.c.l.b16 %v2187_v35  ;;  %v2216_v2 = vrot.slane %v2206_v53, 7  ;;  %v1692_v3 = vrot.slane %v1679_v49, 3  ;;  %v2201_v4 = vrot.slane %v2121_v52, %v3235_v0 }
 0x244   : > { %v2215_v6 = vsel %vm619_vm3, %v2205_v54, %v2214_v56  ;;  %v1691_v40 = vsel %vm628_vm6, %v1690_v59, %v1689_v39  ;;  %v2208_v60 = vunpack.c.l.b16 %v2194_v25  ;;  %v3068_v22 = vmov 857870592  }
 0x245   : > { %v2218_v47 = vrot.slane %v2207_v38, 6  ;;  %v2217_v57 = vsel %vm622_vm4, %v2216_v2, %v2215_v6  ;;  %v1693_v0 = vsel %vm631_vm7, %v1692_v3, %v1691_v40  ;;  %v957_v28 = vunpack.c.l.s4 %v3068_v22 }
 0x246   : > { %v1694_v26 = vpack.c.b16 %v1693_v0, %v1693_v0  ;;  %v1029_v0 = vld [vmem:[%s3532_s11 + $0x4] sm:$0x1] }
 0x247   : > { %v2219_v30 = vsel %vm625_vm5, %v2218_v47, %v2217_v57  ;;  %v958_v48 = vunpack.c.0.s8 %v957_v28  ;;  %v1026_v57 = vld [vmem:[%s3532_s11 + $0x2] sm:$0x1] }
 0x249   : > { %v3011_v7 = vpop.eup %3010 }
 0x24a   : > { %v778_v31 = vmul.f32 %v3011_v7, %v3274_v11  ;;  %v1780_v11 = vsel %vm631_vm7, %v1779_v33, %v1778_v45  ;;  %v2306_v33 = vsel %vm625_vm5, %v2305_v5, %v2304_v12  ;;  %v1165_v45 = vpack.c.b16 %v1164_v43, %v1164_v43 }
 0x24b   : > { %v1781_v58 = vpack.c.b16 %v1780_v11, %v1780_v11  ;;  %v2308_v61 = vsel %vm628_vm6, %v2307_v55, %v2306_v33  ;;  %v3535_v33 = vsub.s32 %v958_v48, %v3203_v44 }
 0x24c   : > { %v779_v34 = vpack.c.bf16 %v778_v31, %v778_v31  ;;  %v2220_v31 = vrot.slane %v2208_v60, 5 }
 0x24d   : > { %v1786_v7 = vsel %vm721_vm8, %v1781_v58, 0 }
 0x24e   : > { %2923 = vmatmul.mubr.msk.bf16.vlgmr.msra.gmra.mxu1 %vm721_vm8, %v779_v34  ;;  %v2221_v46 = vsel %vm628_vm6, %v2220_v31, %v2219_v30  ;;  %v3067_v34 = vmov 1966171168  }
 0x24f   : > { %2927 = vmatpush3.bf16.xpose.msra.mxu1 %v3424_v62  ;;  %2928 = vmatprep.mubr.msk.bf16.mxu1 %vm3065_vm0, %v3064_v24  ;;  %v2309_v62 = vrot.slane %v1766_v41, 4  ;;  %v2209_v41 = vunpack.c.l.b16 %v2201_v4  ;;  %v917_v12 = vunpack.c.l.s4 %v3067_v34 }
 0x250   : > { %2938 = vmatprep.subr.bf16.mxu1 %v3064_v24 }
 0x251   : > { %v2310_v8 = vsel %vm631_vm7, %v2309_v62, %v2308_v61  ;;  %v2222_v10 = vrot.slane %v2209_v41, 4  ;;  %v918_v63 = vunpack.c.0.s8 %v917_v12  ;;  %v1023_v61 = vld [vmem:[%s3532_s11] sm:$0x1]  ;;  %v1035_v41 = vld [vmem:[%s3532_s11 + $0x8] sm:$0x1] }
 0x252   : > { %v2311_v9 = vpack.c.b16 %v2310_v8, %v2310_v8 }
 0x253   : > { %v2223_v5 = vsel %vm631_vm7, %v2222_v10, %v2221_v46  ;;  %v3524_v11 = vsub.s32 %v918_v63, %v3203_v44  ;;  %v1032_v10 = vld [vmem:[%s3532_s11 + $0x6] sm:$0x1]  ;;  %v1041_v46 = vld [vmem:[%s3532_s11 + $0xc] sm:$0x1] }
 0x254   : > { %v2316_v32 = vsel %vm721_vm8, %v2311_v9, 0  ;;  %v2224_v36 = vpack.c.b16 %v2223_v5, %v2223_v5 }
 0x256   : > { %2929 = vmatmul.mubr.msk.bf16.vlgmr.msra.gmra.mxu1 %vm721_vm8, %v1165_v45 }
 0x257   : > { %2939 = vmatpush3.bf16.xpose.msra.mxu1 %v1786_v7  ;;  %2940 = vmatprep.mubr.msk.bf16.mxu1 %vm3065_vm0, %v3064_v24 }
 0x258   : > { %2950 = vmatprep.subr.bf16.mxu1 %v3064_v24 }
 0x25e   : > { %2941 = vmatmul.mubr.msk.bf16.vlgmr.msra.gmra.mxu1 %vm721_vm8, %v1694_v26 }
 0x25f   : > { %2951 = vmatpush3.bf16.xpose.msra.mxu1 %v2316_v32  ;;  %2952 = vmatprep.mubr.msk.bf16.mxu1 %vm3065_vm0, %v3064_v24  ;;  %v1038_v32 = vld [vmem:[%s3532_s11 + $0xa] sm:$0x1] }
 0x266   : > { %2953 = vmatmul.mubr.msk.bf16.vlgmr.msra.gmra.mxu1 %vm721_vm8, %v2224_v36 }
 0x30e   : > { %v908_v51 = vpop.f32.mrf.mxu1 }
 0x30f   : > { %v914_v35 = vpack.c.bf16 %v908_v51, %v908_v51 }
 0x310   : > { %v2924_v43 = vpop.f32.mrf.mxu1 }
 0x311   : > { %v922_v50 = vrot.slane %v914_v35, %v3524_v11  ;;  %v1044_v35 = vld [vmem:[%s3532_s11 + $0xe] sm:$0x1] }
 0x312   : > { %v911_v55 = vpop.f32.mrf.mxu1 }
 0x313   : > { %v923_v53 = vcombine.high %v922_v50, %v922_v50  ;;  %v930_v49 = vrot.slane %v922_v50, %v3524_v11 }
 0x314   : > { %v2925_v52 = vpop.f32.mrf.mxu1 }
 0x315   : > { %v937_v54 = vrot.slane %v923_v53, %v3524_v11  ;;  %v938_v58 = vcombine.high %v930_v49, %v930_v49  ;;  %v941_v59 = vunpack.i.h.s16 %v930_v49  ;;  %v2825_v25 = vpack.i.b16 %v930_v49, %v930_v49 }
 0x316   : > { %v1293_v56 = vpop.f32.mrf.mxu1 }
 0x317   : > { %v939_v39 = vcombine.high %v937_v54, %v937_v54  ;;  %v943_v62 = vunpack.i.h.s16 %v937_v54  ;;  %v945_v38 = vunpack.i.h.s16 %v938_v58  ;;  %v949_v45 = vpack.i.b16 %v941_v59, %v941_v59 }
 0x318   : > { %v2826_v2 = vpack.i.b16 %v937_v54, %v937_v54  ;;  %v2827_v3 = vpack.i.b16 %v938_v58, %v938_v58  ;;  %v962_v4 = vrot.slane %v2825_v25, %v3535_v33  ;;  %v1294_v6 = vadd.f32 %v3270_v1, %v1293_v56  ;;  %v2930_v7 = vpop.f32.mrf.mxu1 }
 0x319   : > { %v947_v40 = vunpack.i.h.s16 %v939_v39  ;;  %v951_v60 = vpack.i.b16 %v943_v62, %v943_v62  ;;  %v953_v8 = vpack.i.b16 %v945_v38, %v945_v38  ;;  %v2828_v47 = vpack.i.b16 %v939_v39, %v939_v39 }
 0x31a   : > { %v969_v9 = vrot.slane %v949_v45, %v3535_v33  ;;  %v976_v31 = vrot.slane %v2826_v2, %v3535_v33  ;;  %v990_v30 = vrot.slane %v2827_v3, %v3535_v33  ;;  %v1024_v26 = vsel %vm3539_vm12, %v962_v4, %v1023_v61  ;;  %v1296_v5 = vpop.f32.mrf.mxu1 }
 0x31b   : > { %v955_v36 = vpack.i.b16 %v947_v40, %v947_v40  ;;  %v983_v34 = vrot.slane %v951_v60, %v3535_v33  ;;  %v997_v12 = vrot.slane %v953_v8, %v3535_v33  ;;  %v1004_v63 = vrot.slane %v2828_v47, %v3535_v33  ;;  %1025 = vst [vmem:[%s3532_s11] sm:$0x1] %v1024_v26 }
 0x31c   : > { %v1027_v22 = vsel %vm3539_vm12, %v969_v9, %v1026_v57  ;;  %v1030_v28 = vsel %vm3539_vm12, %v976_v31, %v1029_v0  ;;  %v1036_v51 = vsel %vm3539_vm12, %v990_v30, %v1035_v41  ;;  %v1299_v48 = vsel %vm721_vm8, %v1294_v6, -inf  ;;  %v2931_v43 = vpop.f32.mrf.mxu1 }
 0x31d   : > { %v1011_v50 = vrot.slane %v955_v36, %v3535_v33  ;;  %1028 = vst [vmem:[%s3532_s11 + $0x2] sm:$0x1] %v1027_v22  ;;  %1031 = vst [vmem:[%s3532_s11 + $0x4] sm:$0x1] %v1030_v28  ;;  %v1033_v55 = vsel %vm3539_vm12, %v983_v34, %v1032_v10  ;;  %v1039_v53 = vsel %vm3539_vm12, %v997_v12, %v1038_v32  ;;  %1300 = vmax.xlane.f32.xlu1 %v1299_v48 }
 0x31e   : > { %1037 = vst [vmem:[%s3532_s11 + $0x8] sm:$0x1] %v1036_v51  ;;  %v1042_v49 = vsel %vm3539_vm12, %v1004_v63, %v1041_v46  ;;  %1034 = vst [vmem:[%s3532_s11 + $0x6] sm:$0x1] %v1033_v55  ;;  %v1822_v52 = vpop.f32.mrf.mxu1  ;;  %v1383_v26 = vrot.slane %v844_v16, 1  ;;  %v1385_v10 = vrot.slane %v846_v19, 7 }
 0x31f   : > { %1040 = vst [vmem:[%s3532_s11 + $0xa] sm:$0x1] %v1039_v53  ;;  %1043 = vst [vmem:[%s3532_s11 + $0xc] sm:$0x1] %v1042_v49  ;;  %v1045_v54 = vsel %vm3539_vm12, %v1011_v50, %v1044_v35  ;;  %v1823_v58 = vadd.f32 %v3270_v1, %v1822_v52  ;;  %v1387_v46 = vrot.slane %v847_v21, 6  ;;  %v1389_v5 = vrot.slane %v848_v27, 5 }
 0x320   : > { %1046 = vst [vmem:[%s3532_s11 + $0xe] sm:$0x1] %v1045_v54  ;;  %v2942_v59 = vpop.f32.mrf.mxu1  ;;  %v1384_v32 = vsel %vm613_vm1, %v845_v17, %v1383_v26  ;;  %v1391_v36 = vrot.slane %v849_v37, 4  ;;  %v1393_v16 = vrot.slane %v3831_v15, 3  ;;  %v3832_v17 = vunpack.c.l.b16 %v3318_v42 }
 0x321   : > { %v1828_v25 = vsel %vm721_vm8, %v1823_v58, -inf  ;;  %v1386_v13 = vsel %vm616_vm2, %v1385_v10, %v1384_v32  ;;  %v2860_v37 = vld.sshfl [vmem:[%s3279_s7] sm:$0x2 pattern:$0x76325410] }
 0x322   : > { %1829 = vmax.xlane.f32.xlu1 %v1828_v25  ;;  %v1825_v56 = vpop.f32.mrf.mxu1  ;;  %v1388_v14 = vsel %vm619_vm3, %v1387_v46, %v1386_v13  ;;  %v1395_v18 = vrot.slane %v3832_v17, 2  ;;  %v2861_v42 = vld.sshfl [vmem:[%s3279_s7 + $0x2] sm:$0x2 pattern:$0x76325410]  ;;  %v1904_v34 = vunpack.c.l.b16 %v2860_v37 }
 0x323   : > { %v1390_v19 = vsel %vm622_vm4, %v1389_v5, %v1388_v14  ;;  %v1905_v12 = vunpack.c.l.b16 %v2861_v42  ;;  %v2863_v63 = vld.sshfl [vmem:[%s3279_s7 + $0x6] sm:$0x2 pattern:$0x76325410] }
 0x324   : > { %v2943_v39 = vpop.f32.mrf.mxu1  ;;  %v1392_v20 = vsel %vm625_vm5, %v1391_v36, %v1390_v19  ;;  %v2862_v22 = vld.sshfl [vmem:[%s3279_s7 + $0x4] sm:$0x2 pattern:$0x76325410]  ;;  %v1912_v28 = vrot.slane %v1904_v34, 2  ;;  %v1907_v48 = vunpack.c.l.b16 %v2863_v63  ;;  %v2442_v59 = vrot.slane %v1904_v34, 3 }
 0x325   : > { %v1394_v21 = vsel %vm628_vm6, %v1393_v16, %v1392_v20  ;;  %v1913_v51 = vrot.slane %v1905_v12, 1  ;;  %v2864_v35 = vld.sshfl [vmem:[%s3279_s7 + $0x8] sm:$0x2 pattern:$0x76325410]  ;;  %v1906_v43 = vunpack.c.l.b16 %v2862_v22  ;;  %v2443_v25 = vrot.slane %v1905_v12, 2 }
 0x326   : > { %v2352_v62 = vpop.f32.mrf.mxu1  ;;  %v1396_v23 = vsel %vm631_vm7, %v1395_v18, %v1394_v21  ;;  %v2865_v55 = vld.sshfl [vmem:[%s3279_s7 + $0xa] sm:$0x2 pattern:$0x76325410]  ;;  %v1908_v53 = vunpack.c.l.b16 %v2864_v35  ;;  %v1916_v49 = vrot.slane %v1907_v48, 7 }
 0x327   : > { %v2353_v38 = vadd.f32 %v3270_v1, %v2352_v62  ;;  %v1397_v27 = vpack.c.b16 %v1396_v23, %v1396_v23  ;;  %v1914_v50 = vsel %vm613_vm1, %v1913_v51, %v1912_v28  ;;  %v2866_v54 = vld.sshfl [vmem:[%s3279_s7 + $0xc] sm:$0x2 pattern:$0x76325410] }
 0x328   : > { %v2954_v45 = vpop.f32.mrf.mxu1  ;;  %v1915_v52 = vsel %vm616_vm2, %v1906_v43, %v1914_v50  ;;  %v1918_v56 = vrot.slane %v1908_v53, 6  ;;  %v2867_v62 = vld.sshfl [vmem:[%s3279_s7 + $0xe] sm:$0x2 pattern:$0x76325410] }
 0x329   : > { %v2358_v61 = vsel %vm721_vm8, %v2353_v38, -inf  ;;  %v1402_v29 = vsel %vm870_vm9, %v1397_v27, 0  ;;  %v1917_v39 = vsel %vm619_vm3, %v1916_v49, %v1915_v52  ;;  %v2445_v45 = vrot.slane %v1906_v43, 1  ;;  %v2085_v52 = vld [vmem:[%s3532_s11 + $0x2] sm:$0x2] }
 0x32a   : > { %2359 = vmax.xlane.f32.xlu0 %v2358_v61  ;;  %v2355_v2 = vpop.f32.mrf.mxu1  ;;  %2933 = vmatpush3.bf16.msra.mxu0 %v1402_v29 }
 0x32b   : > { %2944 = vmatprep.subr.bf16.mxu0 %v3064_v24 }
 0x32c   : > { %v2955_v3 = vpop.f32.mrf.mxu1 }
 0x32d   : > { %v2444_v3 = vsel %vm613_vm1, %v2443_v25, %v2442_v59  ;;  %vm2609_vm1 = vsmask.f32 7942 }
 0x3a6   : > { %v1301_v44 = vpop.xlane.xlu1 %1300 }
 0x3a7   : > { %v1302_v4 = vsub.f32 %v1294_v6, %v1301_v44  ;;  %v1919_v44 = vsel %vm622_vm4, %v1918_v56, %v1917_v39 }
 0x3a9   : > { %v1303_v7 = vmul.f32 1.442695, %v1302_v4  ;;  %v1911_v4 = vunpack.c.l.b16 %v2867_v62 }
 0x3ab   : > { %3012 = vpow2.f32 %v1303_v7  ;;  %v1830_v40 = vpop.xlane.xlu1 %1829  ;;  %v2454_v13 = vrot.slane %v1911_v4, 4 }
 0x3ac   : > { %v1831_v60 = vsub.f32 %v1823_v58, %v1830_v40  ;;  %v1909_v58 = vunpack.c.l.b16 %v2865_v55  ;;  %v2446_v40 = vsel %vm616_vm2, %v2445_v45, %v2444_v3 }
 0x3ae   : > { %v1832_v8 = vmul.f32 1.442695, %v1831_v60  ;;  %v1920_v2 = vrot.slane %v1909_v58, 5 }
 0x3b0   : > { %3014 = vpow2.f32 %v1832_v8  ;;  %v1921_v60 = vsel %vm625_vm5, %v1920_v2, %v1919_v44 }
 0x3b3   : > { %v2360_v47 = vpop.xlane.xlu0 %2359 }
 0x3b4   : > { %v2361_v57 = vsub.f32 %v2353_v38, %v2360_v47  ;;  %v1910_v38 = vunpack.c.l.b16 %v2866_v54  ;;  %v2448_v47 = vrot.slane %v1908_v53, 7 }
 0x3b6   : > { %v2362_v0 = vmul.f32 1.442695, %v2361_v57  ;;  %v1922_v7 = vrot.slane %v1910_v38, 4  ;;  %v1924_v57 = vrot.slane %v1911_v4, 3  ;;  %v2452_v10 = vrot.slane %v1910_v38, 5 }
 0x3b8   : > { %v3589_v41 = vpop.eup %3012  ;;  %3016 = vpow2.f32 %v2362_v0  ;;  %v2447_v0 = vsel %vm619_vm3, %v1907_v48, %v2446_v40  ;;  %vm3762_vm3 = vmand %vm2079_vm15, %vm2609_vm1 }
 0x3b9   : > { %v1305_v1 = vsel %vm721_vm8, %v3589_v41, 0.0 }
 0x3ba   : > { %1306 = vadd.xlane.f32.xlu1 %v1305_v1  ;;  %v1923_v1 = vsel %vm628_vm6, %v1922_v7, %v1921_v60 }
 0x3bb   : > { %v1925_v26 = vsel %vm631_vm7, %v1924_v57, %v1923_v1  ;;  %v1555_v57 = vld [vmem:[%s3532_s11 + $0x2] sm:$0x1]  ;;  %v1564_v1 = vld [vmem:[%s3532_s11 + $0x8] sm:$0x1] }
 0x3bc   : > { %v1926_v5 = vpack.c.b16 %v1925_v26, %v1925_v26  ;;  %v1561_v26 = vld [vmem:[%s3532_s11 + $0x6] sm:$0x1] }
 0x3bd   : > { %v3593_v9 = vpop.eup %3014 }
 0x3be   : > { %v1834_v6 = vsel %vm721_vm8, %v3593_v9, 0.0  ;;  %v1931_v17 = vsel %vm870_vm9, %v1926_v5, 0 }
 0x3bf   : > { %1835 = vadd.xlane.f32.xlu0 %v1834_v6  ;;  %v2450_v6 = vrot.slane %v1909_v58, 6 }
 0x3c5   : > { %v3597_v31 = vpop.eup %3016 }
 0x3c6   : > { %v2364_v30 = vsel %vm721_vm8, %v3597_v31, 0.0 }
 0x3c7   : > { %2365 = vadd.xlane.f32.xlu1 %v2364_v30  ;;  %v2449_v30 = vsel %vm622_vm4, %v2448_v47, %v2447_v0  ;;  %v1558_v0 = vld [vmem:[%s3532_s11 + $0x4] sm:$0x1] }
 0x3c8   : > { %v2451_v32 = vsel %vm625_vm5, %v2450_v6, %v2449_v30 }
 0x3c9   : > { %v2453_v16 = vsel %vm628_vm6, %v2452_v10, %v2451_v32  ;;  %v1567_v32 = vld [vmem:[%s3532_s11 + $0xa] sm:$0x1] }
 0x3ca   : > { %v2455_v18 = vsel %vm631_vm7, %v2454_v13, %v2453_v16 }
 0x3cb   : > { %v2456_v21 = vpack.c.b16 %v2455_v18, %v2455_v18 }
 0x3cd   : > { %v2461_v23 = vsel %vm870_vm9, %v2456_v21, 0 }
 0x443   : > { %v1307_v61 = vpop.xlane.xlu1 %1306 }
 0x444   : > { %3018 = vrcp.f32 %v1307_v61  ;;  %v1552_v61 = vld [vmem:[%s3532_s11] sm:$0x1] }
 0x448   : > { %v1836_v8 = vpop.xlane.xlu0 %1835 }
 0x449   : > { %3020 = vrcp.f32 %v1836_v8 }
 0x450   : > { %v2366_v46 = vpop.xlane.xlu1 %2365 }
 0x451   : > { %v3019_v36 = vpop.eup %3018  ;;  %3022 = vrcp.f32 %v2366_v46  ;;  %v1570_v46 = vld [vmem:[%s3532_s11 + $0xc] sm:$0x1] }
 0x452   : > { %v1309_v15 = vmul.f32 %v3019_v36, %v3589_v41 }
 0x454   : > { %v1310_v14 = vpack.c.bf16 %v1309_v15, %v1309_v15 }
 0x456   : > { %v3021_v19 = vpop.eup %3020  ;;  %2935 = vmatmul.mubr.msk.bf16.vlgmr.msra.gmra.mxu0 %vm721_vm8, %v1310_v14 }
 0x457   : > { %2945 = vmatpush3.bf16.msra.mxu0 %v1931_v17  ;;  %2946 = vmatprep.mubr.msk.bf16.mxu0 %vm3065_vm0, %v3064_v24  ;;  %v1838_v20 = vmul.f32 %v3021_v19, %v3593_v9  ;;  %v1573_v17 = vld [vmem:[%s3532_s11 + $0xe] sm:$0x1] }
 0x458   : > { %2956 = vmatprep.subr.bf16.mxu0 %v3064_v24 }
 0x459   : > { %v1839_v41 = vpack.c.bf16 %v1838_v20, %v1838_v20 }
 0x45e   : > { %v3023_v27 = vpop.eup %3022  ;;  %2947 = vmatmul.mubr.msk.bf16.vlgmr.msra.gmra.mxu0 %vm721_vm8, %v1839_v41 }
 0x45f   : > { %2957 = vmatpush3.bf16.msra.mxu0 %v2461_v23  ;;  %2958 = vmatprep.mubr.msk.bf16.mxu0 %vm3065_vm0, %v3064_v24  ;;  %v2368_v29 = vmul.f32 %v3023_v27, %v3597_v31  ;;  %vm2080_vm0 = vsmask.f32 1280 }
 0x460   : > { %vm3714_vm2 = vmand %vm2079_vm15, %vm2080_vm0 }
 0x461   : > { %v2369_v37 = vpack.c.bf16 %v2368_v29, %v2368_v29 }
 0x466   : > { %2959 = vmatmul.mubr.msk.bf16.vlgmr.msra.gmra.mxu0 %vm721_vm8, %v2369_v37 }
 0x516   : > { %v1438_v42 = vpop.f32.mrf.mxu0 }
 0x517   : > { %v1444_v9 = vpack.c.bf16 %v1438_v42, %v1438_v42 }
 0x518   : > { %v2936_v34 = vpop.f32.mrf.mxu0 }
 0x519   : > { %v1452_v12 = vrot.slane %v1444_v9, %v3524_v11 }
 0x51a   : > { %v1441_v63 = vpop.f32.mrf.mxu0 }
 0x51b   : > { %v1453_v22 = vcombine.high %v1452_v12, %v1452_v12  ;;  %v1460_v28 = vrot.slane %v1452_v12, %v3524_v11 }
 0x51c   : > { %v2937_v51 = vpop.f32.mrf.mxu0 }
 0x51d   : > { %v1467_v35 = vrot.slane %v1453_v22, %v3524_v11  ;;  %v1468_v48 = vcombine.high %v1460_v28, %v1460_v28  ;;  %v1471_v24 = vunpack.i.h.s16 %v1460_v28  ;;  %v2847_v43 = vpack.i.b16 %v1460_v28, %v1460_v28  ;;  %v2082_v51 = vld [vmem:[%s3532_s11] sm:$0x2] }
 0x51e   : > { %v1967_v31 = vpop.f32.mrf.mxu0 }
 0x51f   : > { %v1469_v50 = vcombine.high %v1467_v35, %v1467_v35  ;;  %v1473_v55 = vunpack.i.h.s16 %v1467_v35  ;;  %v1475_v53 = vunpack.i.h.s16 %v1468_v48  ;;  %v1479_v49 = vpack.i.b16 %v1471_v24, %v1471_v24 }
 0x520   : > { %v2848_v54 = vpack.i.b16 %v1467_v35, %v1467_v35  ;;  %v2849_v58 = vpack.i.b16 %v1468_v48, %v1468_v48  ;;  %v1492_v59 = vrot.slane %v2847_v43, %v3535_v33  ;;  %v1973_v25 = vpack.c.bf16 %v1967_v31, %v1967_v31  ;;  %v2948_v56 = vpop.f32.mrf.mxu0 }
 0x521   : > { %v1477_v39 = vunpack.i.h.s16 %v1469_v50  ;;  %v1481_v62 = vpack.i.b16 %v1473_v55, %v1473_v55  ;;  %v1483_v38 = vpack.i.b16 %v1475_v53, %v1475_v53  ;;  %v2850_v45 = vpack.i.b16 %v1469_v50, %v1469_v50 }
 0x522   : > { %v1499_v2 = vrot.slane %v1479_v49, %v3535_v33  ;;  %v1506_v3 = vrot.slane %v2848_v54, %v3535_v33  ;;  %v1520_v44 = vrot.slane %v2849_v58, %v3535_v33  ;;  %v1553_v4 = vsel %vm3665_vm14, %v1492_v59, %v1552_v61  ;;  %v1970_v7 = vpop.f32.mrf.mxu0  ;;  %v2088_v54 = vld [vmem:[%s3532_s11 + $0x4] sm:$0x2]  ;;  %v2094_v58 = vld [vmem:[%s3532_s11 + $0x8] sm:$0x2]  ;;  %v2100_v61 = vld [vmem:[%s3532_s11 + $0xc] sm:$0x2] }
 0x523   : > { %v1485_v40 = vpack.i.b16 %v1477_v39, %v1477_v39  ;;  %v1513_v60 = vrot.slane %v1481_v62, %v3535_v33  ;;  %v1527_v8 = vrot.slane %v1483_v38, %v3535_v33  ;;  %v1534_v47 = vrot.slane %v2850_v45, %v3535_v33  ;;  %1554 = vst [vmem:[%s3532_s11] sm:$0x1] %v1553_v4  ;;  %v2091_v38 = vld [vmem:[%s3532_s11 + $0x6] sm:$0x2]  ;;  %v2097_v45 = vld [vmem:[%s3532_s11 + $0xa] sm:$0x2] }
 0x524   : > { %v1556_v6 = vsel %vm3665_vm14, %v1499_v2, %v1555_v57  ;;  %v1559_v30 = vsel %vm3665_vm14, %v1506_v3, %v1558_v0  ;;  %v1565_v10 = vsel %vm3665_vm14, %v1520_v44, %v1564_v1  ;;  %v1981_v5 = vrot.slane %v1973_v25, %v3524_v11  ;;  %v2949_v36 = vpop.f32.mrf.mxu0 }
 0x525   : > { %v1541_v13 = vrot.slane %v1485_v40, %v3535_v33  ;;  %1557 = vst [vmem:[%s3532_s11 + $0x2] sm:$0x1] %v1556_v6  ;;  %1560 = vst [vmem:[%s3532_s11 + $0x4] sm:$0x1] %v1559_v30  ;;  %v1562_v15 = vsel %vm3665_vm14, %v1513_v60, %v1561_v26  ;;  %v1568_v16 = vsel %vm3665_vm14, %v1527_v8, %v1567_v32  ;;  %v2103_v8 = vld [vmem:[%s3532_s11 + $0xe] sm:$0x2] }
 0x526   : > { %1566 = vst [vmem:[%s3532_s11 + $0x8] sm:$0x1] %v1565_v10  ;;  %v1571_v14 = vsel %vm3665_vm14, %v1534_v47, %v1570_v46  ;;  %1563 = vst [vmem:[%s3532_s11 + $0x6] sm:$0x1] %v1562_v15  ;;  %v1982_v18 = vcombine.high %v1981_v5, %v1981_v5  ;;  %v1989_v19 = vrot.slane %v1981_v5, %v3524_v11  ;;  %v2497_v20 = vpop.f32.mrf.mxu0 }
 0x527   : > { %1569 = vst [vmem:[%s3532_s11 + $0xa] sm:$0x1] %v1568_v16  ;;  %1572 = vst [vmem:[%s3532_s11 + $0xc] sm:$0x1] %v1571_v14  ;;  %v1574_v21 = vsel %vm3665_vm14, %v1541_v13, %v1573_v17  ;;  %v2503_v41 = vpack.c.bf16 %v2497_v20, %v2497_v20 }
 0x528   : > { %1575 = vst [vmem:[%s3532_s11 + $0xe] sm:$0x1] %v1574_v21  ;;  %v1996_v23 = vrot.slane %v1982_v18, %v3524_v11  ;;  %v1997_v27 = vcombine.high %v1989_v19, %v1989_v19  ;;  %v2000_v29 = vunpack.i.h.s16 %v1989_v19  ;;  %v2869_v37 = vpack.i.b16 %v1989_v19, %v1989_v19  ;;  %v2960_v42 = vpop.f32.mrf.mxu0 }
 0x529   : > { %v2511_v9 = vrot.slane %v2503_v41, %v3524_v11 }
 0x52a   : > { %v1998_v34 = vcombine.high %v1996_v23, %v1996_v23  ;;  %v2002_v12 = vunpack.i.h.s16 %v1996_v23  ;;  %v2004_v63 = vunpack.i.h.s16 %v1997_v27  ;;  %v2008_v22 = vpack.i.b16 %v2000_v29, %v2000_v29  ;;  %v2500_v35 = vpop.f32.mrf.mxu0 }
 0x52b   : > { %v2870_v48 = vpack.i.b16 %v1996_v23, %v1996_v23  ;;  %v2871_v24 = vpack.i.b16 %v1997_v27, %v1997_v27  ;;  %v2021_v43 = vrot.slane %v2869_v37, %v3535_v33  ;;  %v2512_v31 = vcombine.high %v2511_v9, %v2511_v9 }
 0x52c   : > { %v2006_v50 = vunpack.i.h.s16 %v1998_v34  ;;  %v2010_v55 = vpack.i.b16 %v2002_v12, %v2002_v12  ;;  %v2012_v53 = vpack.i.b16 %v2004_v63, %v2004_v63  ;;  %v2872_v49 = vpack.i.b16 %v1998_v34, %v1998_v34  ;;  %v2961_v59 = vpop.f32.mrf.mxu0 }
 0x52d   : > { %v2028_v25 = vrot.slane %v2008_v22, %v3535_v33  ;;  %v2035_v56 = vrot.slane %v2870_v48, %v3535_v33  ;;  %v2049_v39 = vrot.slane %v2871_v24, %v3535_v33  ;;  %v2083_v62 = vsel %vm3714_vm2, %v2021_v43, %v2082_v51 }
 0x52e   : > { %v2014_v2 = vpack.i.b16 %v2006_v50, %v2006_v50  ;;  %v2042_v3 = vrot.slane %v2010_v55, %v3535_v33  ;;  %v2056_v44 = vrot.slane %v2012_v53, %v3535_v33  ;;  %v2063_v4 = vrot.slane %v2872_v49, %v3535_v33  ;;  %2084 = vst [vmem:[%s3532_s11] sm:$0x2] %v2083_v62 }
 0x52f   : > { %v2086_v7 = vsel %vm3714_vm2, %v2028_v25, %v2085_v52  ;;  %v2089_v40 = vsel %vm3714_vm2, %v2035_v56, %v2088_v54  ;;  %v2095_v60 = vsel %vm3714_vm2, %v2049_v39, %v2094_v58  ;;  %v2519_v47 = vrot.slane %v2511_v9, %v3524_v11 }
 0x530   : > { %v2070_v57 = vrot.slane %v2014_v2, %v3535_v33  ;;  %2087 = vst [vmem:[%s3532_s11 + $0x2] sm:$0x2] %v2086_v7  ;;  %2090 = vst [vmem:[%s3532_s11 + $0x4] sm:$0x2] %v2089_v40  ;;  %v2092_v0 = vsel %vm3714_vm2, %v2042_v3, %v2091_v38  ;;  %v2098_v1 = vsel %vm3714_vm2, %v2056_v44, %v2097_v45 }
 0x531   : > { %2096 = vst [vmem:[%s3532_s11 + $0x8] sm:$0x2] %v2095_v60  ;;  %v2101_v6 = vsel %vm3714_vm2, %v2063_v4, %v2100_v61  ;;  %2093 = vst [vmem:[%s3532_s11 + $0x6] sm:$0x2] %v2092_v0  ;;  %v2526_v30 = vrot.slane %v2512_v31, %v3524_v11  ;;  %v2527_v26 = vcombine.high %v2519_v47, %v2519_v47  ;;  %v2530_v10 = vunpack.i.h.s16 %v2519_v47 }
 0x532   : > { %2099 = vst [vmem:[%s3532_s11 + $0xa] sm:$0x2] %v2098_v1  ;;  %2102 = vst [vmem:[%s3532_s11 + $0xc] sm:$0x2] %v2101_v6  ;;  %v2891_v32 = vpack.i.b16 %v2519_v47, %v2519_v47  ;;  %v2104_v46 = vsel %vm3714_vm2, %v2070_v57, %v2103_v8 }
 0x533   : > { %2105 = vst [vmem:[%s3532_s11 + $0xe] sm:$0x2] %v2104_v46  ;;  %v2528_v5 = vcombine.high %v2526_v30, %v2526_v30  ;;  %v2532_v36 = vunpack.i.h.s16 %v2526_v30  ;;  %v2534_v13 = vunpack.i.h.s16 %v2527_v26  ;;  %v2538_v15 = vpack.i.b16 %v2530_v10, %v2530_v10 }
 0x534   : > { %v2892_v14 = vpack.i.b16 %v2526_v30, %v2526_v30  ;;  %v2893_v11 = vpack.i.b16 %v2527_v26, %v2527_v26  ;;  %v2551_v17 = vrot.slane %v2891_v32, %v3535_v33 }
 0x535   : > { %v2536_v18 = vunpack.i.h.s16 %v2528_v5  ;;  %v2540_v19 = vpack.i.b16 %v2532_v36, %v2532_v36  ;;  %v2542_v20 = vpack.i.b16 %v2534_v13, %v2534_v13  ;;  %v2894_v21 = vpack.i.b16 %v2528_v5, %v2528_v5  ;;  %v2611_v41 = vld [vmem:[%s3532_s11] sm:$0x2] }
 0x536   : > { %v2558_v23 = vrot.slane %v2538_v15, %v3535_v33  ;;  %v2565_v27 = vrot.slane %v2892_v14, %v3535_v33  ;;  %v2579_v29 = vrot.slane %v2893_v11, %v3535_v33  ;;  %v2612_v37 = vsel %vm3762_vm3, %v2551_v17, %v2611_v41 }
 0x537   : > { %v2544_v42 = vpack.i.b16 %v2536_v18, %v2536_v18  ;;  %v2572_v9 = vrot.slane %v2540_v19, %v3535_v33  ;;  %v2586_v34 = vrot.slane %v2542_v20, %v3535_v33  ;;  %v2593_v12 = vrot.slane %v2894_v21, %v3535_v33  ;;  %2613 = vst [vmem:[%s3532_s11] sm:$0x2] %v2612_v37  ;;  %v2614_v63 = vld [vmem:[%s3532_s11 + $0x2] sm:$0x2]  ;;  %v2617_v22 = vld [vmem:[%s3532_s11 + $0x4] sm:$0x2] }
 0x538   : > { %v2623_v28 = vld [vmem:[%s3532_s11 + $0x8] sm:$0x2]  ;;  %v2615_v51 = vsel %vm3762_vm3, %v2558_v23, %v2614_v63  ;;  %v2618_v35 = vsel %vm3762_vm3, %v2565_v27, %v2617_v22  ;;  %v2620_v48 = vld [vmem:[%s3532_s11 + $0x6] sm:$0x2] }
 0x539   : > { %v2624_v24 = vsel %vm3762_vm3, %v2579_v29, %v2623_v28  ;;  %v2626_v43 = vld [vmem:[%s3532_s11 + $0xa] sm:$0x2]  ;;  %v2629_v31 = vld [vmem:[%s3532_s11 + $0xc] sm:$0x2]  ;;  %v2600_v50 = vrot.slane %v2544_v42, %v3535_v33  ;;  %2616 = vst [vmem:[%s3532_s11 + $0x2] sm:$0x2] %v2615_v51  ;;  %v2621_v55 = vsel %vm3762_vm3, %v2572_v9, %v2620_v48 }
 0x53a   : > { %2619 = vst [vmem:[%s3532_s11 + $0x4] sm:$0x2] %v2618_v35  ;;  %2625 = vst [vmem:[%s3532_s11 + $0x8] sm:$0x2] %v2624_v24  ;;  %v2627_v53 = vsel %vm3762_vm3, %v2586_v34, %v2626_v43  ;;  %v2630_v49 = vsel %vm3762_vm3, %v2593_v12, %v2629_v31  ;;  %v2632_v52 = vld [vmem:[%s3532_s11 + $0xe] sm:$0x2] }
 0x53b   : > { %2622 = vst [vmem:[%s3532_s11 + $0x6] sm:$0x2] %v2621_v55  ;;  %2628 = vst [vmem:[%s3532_s11 + $0xa] sm:$0x2] %v2627_v53  ;;  %v2633_v54 = vsel %vm3762_vm3, %v2600_v50, %v2632_v52 }
 0x53c   : > { %2631 = vst [vmem:[%s3532_s11 + $0xc] sm:$0x2] %v2630_v49  ;;  %2634 = vst [vmem:[%s3532_s11 + $0xe] sm:$0x2] %v2633_v54 }
 0x53d PF: > { %s14_s19 = sadd.s32 1, %s3062_s19   ;;  %s3839_s15 = smov %s3050_s16 }
 0x53e   : > { %p11_p10 = scmp.ge.s32.totalorder %s14_s19, 4   ;;  %s3840_s16 = smov %s3133_s24 }
 0x53f   : > { %s3841_s17 = smov %s3058_s18  ;;  %s3842_s18 = smov %s3844_s20 }
 0x540   :  { %13 = sbr.rel (!%p11_p10) target bundleno = 3 (0x3), region = 213 }

</bundles_post_ra>
